<compile_context>
chip_gen: v5e
topology: v5e:2x2
jax: 0.10.0
libtpu: 0.0.40
codegen_flags: <defaults>
</compile_context>

<pallas_src>
import functools
import math

import jax
import jax.numpy as jnp
from jax import lax
from jax.experimental import pallas as pl
from jax.experimental.pallas import tpu as pltpu


# --------------------- fused full-decoder layer kernel ----------------------

def _decoder_kernel(x_ref, kv_ref, sa_wqkv_ref, sa_wo_ref,
                    ca_wq_ref, ca_wkv_ref, ca_wo_ref,
                    ff_w1_ref, ff_b1_ref, ff_w2_ref, ff_b2_ref, ln_ref,
                    o_ref, x_sc, *, num_head, head_dim,
                    scale_self, scale_cross, compute_dtype, approx_recip):
    l = pl.program_id(1)                   # layer index (sequential / arbitrary)
    cd = compute_dtype
    HD = num_head * head_dim

    # Load the residual stream for this batch item once (layer 0 only).
    @pl.when(l == 0)
    def _():
        x_sc[...] = x_ref[0]

    x = x_sc[...]                          # (S, E) f32 residual carry
    ln = ln_ref[0]                         # (6, E): norm_g, norm_b, ln1_g, ln1_b, ln2_g, ln2_b

    def layer_norm(y, g, b):
        # torch nn.LayerNorm: biased variance, eps=1e-5, f32 math.
        mean = jnp.mean(y, axis=-1, keepdims=True)
        var = jnp.mean(jnp.square(y - mean), axis=-1, keepdims=True)
        return (y - mean) * lax.rsqrt(var + 1e-5) * g + b

    def mha(in_q, in_k, in_v, wo, scale):
        # in_q:(S,H*D), in_k/in_v:(T,H*D), all f32 accumulations of projections.
        # Fold the 1/sqrt(T) scale (torch scales logits; positive scale keeps
        # the same "!= 0" mask, differs only in fp rounding).
        in_q = in_q * scale
        heads = []
        for h in range(num_head):          # static, small head loop
            lo = h * head_dim
            hi = lo + head_dim
            qh = in_q[:, lo:hi].astype(cd)
            kh = in_k[:, lo:hi].astype(cd)
            vh = in_v[:, lo:hi].astype(cd)
            # Contract D of both operands -> no explicit K^T materialized.
            logits = lax.dot_general(
                qh, kh, dimension_numbers=(((1,), (1,)), ((), ())),
                preferred_element_type=jnp.float32)
            # Bug-compatible with the torch reference (masks=None still maps
            # exact zeros to -9e15).
            logits = jnp.where(logits != 0.0, logits, jnp.float32(-9.0e15))
            m = jnp.max(logits, axis=-1, keepdims=True)
            e = jnp.exp(logits - m)
            denom = jnp.sum(e, axis=-1, keepdims=True)
            atten = e * pl.reciprocal(denom, approx=approx_recip)
            heads.append(jnp.dot(atten.astype(cd), vh,
                                 preferred_element_type=jnp.float32))
        concat = jnp.concatenate(heads, axis=-1)         # (S, H*D) torch order
        return jnp.dot(concat.astype(cd), wo,
                       preferred_element_type=jnp.float32)

    # ---- self-attention + residual + decoder norm --------------------------
    xc = x.astype(cd)
    qkv = jnp.dot(xc, sa_wqkv_ref[0], preferred_element_type=jnp.float32)
    h = mha(qkv[:, :HD], qkv[:, HD:2 * HD], qkv[:, 2 * HD:],
            sa_wo_ref[0], scale_self)
    x1 = layer_norm(h + x, ln[0:1], ln[1:2])

    # ---- cross-attention + residual + layer_norm1 ---------------------------
    kvc = kv_ref[0].astype(cd)
    q_proj = jnp.dot(x1.astype(cd), ca_wq_ref[0],
                     preferred_element_type=jnp.float32)
    kv_proj = jnp.dot(kvc, ca_wkv_ref[0], preferred_element_type=jnp.float32)
    h1 = mha(q_proj, kv_proj[:, :HD], kv_proj[:, HD:], ca_wo_ref[0],
             scale_cross)
    x2 = layer_norm(h1 + x1, ln[2:3], ln[3:4])

    # ---- FFN + residual + layer_norm2 ---------------------------------------
    hff = jnp.dot(x2.astype(cd), ff_w1_ref[0],
                  preferred_element_type=jnp.float32)
    hff = jnp.maximum(hff + ff_b1_ref[0], 0.0)
    yff = jnp.dot(hff.astype(cd), ff_w2_ref[0],
                  preferred_element_type=jnp.float32)
    x3 = layer_norm(yff + ff_b2_ref[0] + x2, ln[4:5], ln[5:6])

    x_sc[...] = x3                          # carry to next layer

    @pl.when(l == pl.num_programs(1) - 1)
    def _():
        o_ref[0] = x3


# --------------------------- parameter stacking ------------------------------

def stack_decoder_params(params):
    """Stack per-layer params along a leading depth axis (fused layouts)."""
    layers = params["layers"]

    def st(name):
        return jnp.stack([p[name] for p in layers], axis=0)

    sa_wqkv = jnp.stack(
        [jnp.concatenate([p["sa_wq"], p["sa_wk"], p["sa_wv"]], axis=1)
         for p in layers], axis=0)                                # (L, E, 3HD)
    ca_wkv = jnp.stack(
        [jnp.concatenate([p["ca_wk"], p["ca_wv"]], axis=1)
         for p in layers], axis=0)                                # (L, E, 2HD)
    ln = jnp.stack(
        [jnp.stack([p["norm_g"], p["norm_b"], p["ln1_g"], p["ln1_b"],
                    p["ln2_g"], p["ln2_b"]], axis=0)
         for p in layers], axis=0)                                # (L, 6, E)
    return dict(
        sa_wqkv=sa_wqkv, sa_wo=st("sa_wo"),
        ca_wq=st("ca_wq"), ca_wkv=ca_wkv, ca_wo=st("ca_wo"),
        ff_w1=st("ff_w1"), ff_w2=st("ff_w2"),
        ff_b1=st("ff_b1")[:, None, :],                            # (L, 1, Hd)
        ff_b2=st("ff_b2")[:, None, :],                            # (L, 1, E)
        ln=ln)


# --------------------------- decoder forward (glue) --------------------------

def transformer_decoder_forward(x, kv, stacked, *, num_head,
                                compute_dtype=jnp.float32):
    """Post-norm TransformerDecoder.forward with enc=None, masks=None, dropout=0."""
    B, S, E = x.shape
    T = kv.shape[1]
    depth = stacked["sa_wqkv"].shape[0]
    HD = stacked["sa_wo"].shape[1]
    head_dim = HD // num_head
    Hd = stacked["ff_w1"].shape[2]
    cd = compute_dtype
    approx = bool(jnp.dtype(cd) != jnp.dtype(jnp.float32))

    kern = functools.partial(
        _decoder_kernel, num_head=num_head, head_dim=head_dim,
        scale_self=1.0 / math.sqrt(S), scale_cross=1.0 / math.sqrt(T),
        compute_dtype=cd, approx_recip=approx)

    wspec = lambda r, c: pl.BlockSpec((1, r, c), lambda b, l: (l, 0, 0))

    # TODO(synk): for very long S/T the (S,E)/(T,E) blocks should additionally
    # be tiled over the sequence dim; not needed at this module's configuration.
    return pl.pallas_call(
        kern,
        grid=(B, depth),
        in_specs=[
            pl.BlockSpec((1, S, E), lambda b, l: (b, 0, 0)),      # x
            pl.BlockSpec((1, T, E), lambda b, l: (b, 0, 0)),      # kv (memory)
            wspec(E, 3 * HD),                                     # sa_wqkv
            wspec(HD, E),                                         # sa_wo
            wspec(E, HD),                                         # ca_wq
            wspec(E, 2 * HD),                                     # ca_wkv
            wspec(HD, E),                                         # ca_wo
            wspec(E, Hd),                                         # ff_w1
            wspec(1, Hd),                                         # ff_b1
            wspec(Hd, E),                                         # ff_w2
            wspec(1, E),                                          # ff_b2
            wspec(6, E),                                          # ln params
        ],
        out_specs=pl.BlockSpec((1, S, E), lambda b, l: (b, 0, 0)),
        out_shape=jax.ShapeDtypeStruct((B, S, E), jnp.float32),
        scratch_shapes=[pltpu.VMEM((S, E), jnp.float32)],
        compiler_params=pltpu.CompilerParams(
            dimension_semantics=("parallel", "arbitrary")),
    )(x, kv,
      stacked["sa_wqkv"].astype(cd), stacked["sa_wo"].astype(cd),
      stacked["ca_wq"].astype(cd), stacked["ca_wkv"].astype(cd),
      stacked["ca_wo"].astype(cd), stacked["ff_w1"].astype(cd),
      stacked["ff_b1"], stacked["ff_w2"].astype(cd),
      stacked["ff_b2"], stacked["ln"])


# ------------------------------ pure-JAX ref ----------------------------------

def _ref_mha(q, kv, wq, wk, wv, wo, num_head):
    T = kv.shape[1]
    D = wq.shape[1] // num_head
    outs = []
    for h in range(num_head):
        sl = slice(h * D, (h + 1) * D)
        in_q = q @ wq[:, sl]
        in_k = kv @ wk[:, sl]
        in_v = kv @ wv[:, sl]
        logits = (in_q @ jnp.swapaxes(in_k, -1, -2)) / (T ** 0.5)
        logits = jnp.where(logits != 0.0, logits, -9.0e15)
        a = jax.nn.softmax(logits, axis=-1)
        outs.append(a @ in_v)
    return jnp.concatenate(outs, axis=-1) @ wo


def _ref_ln(x, g, b):
    m = jnp.mean(x, axis=-1, keepdims=True)
    v = jnp.mean(jnp.square(x - m), axis=-1, keepdims=True)
    return (x - m) / jnp.sqrt(v + 1e-5) * g + b


def _ref_forward(params, x, kv):
    H = params["num_head"]
    for p in params["layers"]:
        h = _ref_mha(x, x, p["sa_wq"], p["sa_wk"], p["sa_wv"], p["sa_wo"], H)
        x = _ref_ln(x + h, p["norm_g"], p["norm_b"])
        h1 = _ref_mha(x, kv, p["ca_wq"], p["ca_wk"], p["ca_wv"], p["ca_wo"], H)
        h1 = _ref_ln(h1 + x, p["ln1_g"], p["ln1_b"])
        h2 = jnp.maximum(h1 @ p["ff_w1"] + p["ff_b1"], 0.0) @ p["ff_w2"] + p["ff_b2"]
        x = _ref_ln(h2 + h1, p["ln2_g"], p["ln2_b"])
    return x


# --------------------------------- params -------------------------------------

def init_params(key, E, D, H, depth, hidden):
    HD = H * D
    layers = []
    for i in range(depth):
        ks = jax.random.split(jax.random.fold_in(key, i), 12)

        def w(kk, shape, fan_in):
            return jax.random.normal(kk, shape, jnp.float32) / jnp.sqrt(float(fan_in))

        layers.append(dict(
            sa_wq=w(ks[0], (E, HD), E),
            sa_wk=w(ks[1], (E, HD), E),
            sa_wv=w(ks[2], (E, HD), E),
            sa_wo=w(ks[3], (HD, E), HD),
            norm_g=jnp.ones((E,), jnp.float32),
            norm_b=jnp.zeros((E,), jnp.float32),
            ca_wq=w(ks[4], (E, HD), E),
            ca_wk=w(ks[5], (E, HD), E),
            ca_wv=w(ks[6], (E, HD), E),
            ca_wo=w(ks[7], (HD, E), HD),
            ln1_g=jnp.ones((E,), jnp.float32),
            ln1_b=jnp.zeros((E,), jnp.float32),
            ln2_g=jnp.ones((E,), jnp.float32),
            ln2_b=jnp.zeros((E,), jnp.float32),
            # TODO(synk): FF module source not provided; assumed Linear->ReLU->Linear,
            # hidden = 2*emb_dim, bias=True (matches FF(emb, emb, emb*2)).
            ff_w1=w(ks[8], (E, hidden), E),
            ff_b1=0.01 * jax.random.normal(ks[9], (hidden,), jnp.float32),
            ff_w2=w(ks[10], (hidden, E), hidden),
            ff_b2=0.01 * jax.random.normal(ks[11], (E,), jnp.float32),
        ))
    return {"layers": layers, "num_head": H}


# ---------------------------------- main ---------------------------------------

if __name__ == "__main__":
    # TODO(synk): sn (spectral_norm), sln (SLN), dropout>0, enc!=None, masks and
    # attention-map outputs are not exercised in this configuration.
    B, S, T = 2, 8, 8
    E = 32          # emb_dim
    D = E           # in_emb_dim defaults to emb_dim
    H = 2           # num_head
    depth = 2
    hidden = 2 * E  # FF hidden

    key = jax.random.PRNGKey(0)
    params = init_params(key, E, D, H, depth, hidden)
    kx, kkv = jax.random.split(jax.random.fold_in(key, 1234))
    x = jax.random.normal(kx, (B, S, E), jnp.float32)
    kv = jax.random.normal(kkv, (B, T, E), jnp.float32)

    ref = _ref_forward(params, x, kv)
    stacked = stack_decoder_params(params)

    # f32 compute path (bit-faithful to the torch module; strict tolerance)
    out_f32 = jax.block_until_ready(
        transformer_decoder_forward(x, kv, stacked, num_head=H,
                                    compute_dtype=jnp.float32))
    assert out_f32.shape == (B, S, E), out_f32.shape
    err_f32 = float(jnp.max(jnp.abs(out_f32 - ref)))
    assert err_f32 < 2e-4, f"f32 mismatch vs reference, max abs err = {err_f32}"

    # bf16 MXU compute path (f32 accumulation; loose tolerance)
    out_bf16 = jax.block_until_ready(
        transformer_decoder_forward(x, kv, stacked, num_head=H,
                                    compute_dtype=jnp.bfloat16))
    assert bool(jnp.all(jnp.isfinite(out_bf16)))
    err_bf16 = float(jnp.max(jnp.abs(out_bf16 - ref)))
    assert err_bf16 < 0.25, f"bf16 mismatch too large, max abs err = {err_bf16}"

    print("KERNEL_OK")
</pallas_src>

<mosaic_0001>
module attributes {stable_mosaic.version = 11 : i64} {
  func.func @_decoder_kernel(%arg0: i32, %arg1: i32, %arg2: memref<1x8x32xf32, #tpu.memory_space<vmem>>, %arg3: memref<1x8x32xf32, #tpu.memory_space<vmem>>, %arg4: memref<1x32x192xf32, #tpu.memory_space<vmem>>, %arg5: memref<1x64x32xf32, #tpu.memory_space<vmem>>, %arg6: memref<1x32x64xf32, #tpu.memory_space<vmem>>, %arg7: memref<1x32x128xf32, #tpu.memory_space<vmem>>, %arg8: memref<1x64x32xf32, #tpu.memory_space<vmem>>, %arg9: memref<1x32x64xf32, #tpu.memory_space<vmem>>, %arg10: memref<1x1x64xf32, #tpu.memory_space<vmem>>, %arg11: memref<1x64x32xf32, #tpu.memory_space<vmem>>, %arg12: memref<1x1x32xf32, #tpu.memory_space<vmem>>, %arg13: memref<1x6x32xf32, #tpu.memory_space<vmem>>, %arg14: memref<1x8x32xf32, #tpu.memory_space<vmem>>, %arg15: memref<8x32xf32, #tpu.memory_space<vmem>>) attributes {dimension_semantics = [#tpu.dimension_semantics<parallel>, #tpu.dimension_semantics<arbitrary>], iteration_bounds = array<i64: 2, 2>, scalar_prefetch = 0 : i64, scratch_operands = 1 : i64, tpu.core_type = #tpu.core_type<tc>, window_params = [{transform_indices = @transform_0, window_bounds = array<i64: 1, 8, 32>}, {transform_indices = @transform_1, window_bounds = array<i64: 1, 8, 32>}, {transform_indices = @transform_2, window_bounds = array<i64: 1, 32, 192>}, {transform_indices = @transform_3, window_bounds = array<i64: 1, 64, 32>}, {transform_indices = @transform_4, window_bounds = array<i64: 1, 32, 64>}, {transform_indices = @transform_5, window_bounds = array<i64: 1, 32, 128>}, {transform_indices = @transform_6, window_bounds = array<i64: 1, 64, 32>}, {transform_indices = @transform_7, window_bounds = array<i64: 1, 32, 64>}, {transform_indices = @transform_8, window_bounds = array<i64: 1, 1, 64>}, {transform_indices = @transform_9, window_bounds = array<i64: 1, 64, 32>}, {transform_indices = @transform_10, window_bounds = array<i64: 1, 1, 32>}, {transform_indices = @transform_11, window_bounds = array<i64: 1, 6, 32>}, {transform_indices = @transform_12, window_bounds = array<i64: 1, 8, 32>}]} {
    %c0_i32 = arith.constant 0 : i32
    %0 = arith.cmpi eq, %arg1, %c0_i32 : i32
    %1 = arith.extui %0 : i1 to i32
    %c0_i32_0 = arith.constant 0 : i32
    %2 = arith.cmpi ne, %1, %c0_i32_0 : i32
    scf.if %2 {
      %c0_86 = arith.constant 0 : index
      %c0_87 = arith.constant 0 : index
      %c0_88 = arith.constant 0 : index
      %205 = vector.load %arg2[%c0_86, %c0_87, %c0_88] : memref<1x8x32xf32, #tpu.memory_space<vmem>>, vector<1x8x32xf32>
      %206 = vector.shape_cast %205 : vector<1x8x32xf32> to vector<8x32xf32>
      %c0_89 = arith.constant 0 : index
      %c0_90 = arith.constant 0 : index
      %207 = vector.load %arg15[%c0_89, %c0_90] : memref<8x32xf32, #tpu.memory_space<vmem>>, vector<8x32xf32>
      tpu.vector_store %arg15[%c0_89, %c0_90], %206 {strides = array<i32>} : memref<8x32xf32, #tpu.memory_space<vmem>>, vector<8x32xf32>,
    } else {
    }
    %c0 = arith.constant 0 : index
    %c0_1 = arith.constant 0 : index
    %3 = vector.load %arg15[%c0, %c0_1] : memref<8x32xf32, #tpu.memory_space<vmem>>, vector<8x32xf32>
    %c0_2 = arith.constant 0 : index
    %c0_3 = arith.constant 0 : index
    %c0_4 = arith.constant 0 : index
    %4 = vector.load %arg13[%c0_2, %c0_3, %c0_4] : memref<1x6x32xf32, #tpu.memory_space<vmem>>, vector<1x6x32xf32>
    %5 = vector.shape_cast %4 : vector<1x6x32xf32> to vector<6x32xf32>
    %c0_5 = arith.constant 0 : index
    %c0_6 = arith.constant 0 : index
    %c0_7 = arith.constant 0 : index
    %6 = vector.load %arg4[%c0_5, %c0_6, %c0_7] : memref<1x32x192xf32, #tpu.memory_space<vmem>>, vector<1x32x192xf32>
    %7 = vector.shape_cast %6 : vector<1x32x192xf32> to vector<32x192xf32>
    %cst = arith.constant dense<0.000000e+00> : vector<8x192xf32>
    %8 = tpu.matmul %3, %7, %cst {dimension_numbers = #tpu.dot_dimension_numbers<[1], [0], [0], [1], [0, 0, 1, 1], [], []>} : vector<8x32xf32>, vector<32x192xf32>, vector<8x192xf32> -> vector<8x192xf32>
    %9 = vector.extract_strided_slice %8 {offsets = [0, 0], sizes = [8, 64], strides = [1, 1]} : vector<8x192xf32> to vector<8x64xf32>
    %10 = vector.extract_strided_slice %8 {offsets = [0, 64], sizes = [8, 64], strides = [1, 1]} : vector<8x192xf32> to vector<8x64xf32>
    %11 = vector.extract_strided_slice %8 {offsets = [0, 128], sizes = [8, 64], strides = [1, 1]} : vector<8x192xf32> to vector<8x64xf32>
    %c0_8 = arith.constant 0 : index
    %c0_9 = arith.constant 0 : index
    %c0_10 = arith.constant 0 : index
    %12 = vector.load %arg5[%c0_8, %c0_9, %c0_10] : memref<1x64x32xf32, #tpu.memory_space<vmem>>, vector<1x64x32xf32>
    %13 = vector.shape_cast %12 : vector<1x64x32xf32> to vector<64x32xf32>
    %cst_11 = arith.constant 0.353553385 : f32
    %14 = vector.broadcast %cst_11 : f32 to vector<8x64xf32>
    %15 = arith.mulf %9, %14 : vector<8x64xf32>
    %16 = vector.extract_strided_slice %15 {offsets = [0, 0], sizes = [8, 32], strides = [1, 1]} : vector<8x64xf32> to vector<8x32xf32>
    %17 = vector.extract_strided_slice %10 {offsets = [0, 0], sizes = [8, 32], strides = [1, 1]} : vector<8x64xf32> to vector<8x32xf32>
    %18 = vector.extract_strided_slice %11 {offsets = [0, 0], sizes = [8, 32], strides = [1, 1]} : vector<8x64xf32> to vector<8x32xf32>
    %cst_12 = arith.constant dense<0.000000e+00> : vector<8x8xf32>
    %19 = tpu.matmul %16, %17, %cst_12 {dimension_numbers = #tpu.dot_dimension_numbers<[1], [1], [0], [0], [0, 0, 1, 0], [], []>} : vector<8x32xf32>, vector<8x32xf32>, vector<8x8xf32> -> vector<8x8xf32>
    %cst_13 = arith.constant 0.000000e+00 : f32
    %20 = vector.broadcast %cst_13 : f32 to vector<8x8xf32>
    %21 = arith.cmpf one, %19, %20 : vector<8x8xf32>
    %cst_14 = arith.constant -9.000000e+15 : f32
    %22 = vector.broadcast %cst_14 : f32 to vector<8x8xf32>
    %23 = arith.select %21, %19, %22 : vector<8x8xi1>, vector<8x8xf32>
    %cst_15 = arith.constant dense<0xFF800000> : vector<8xf32>
    %24 = vector.multi_reduction <maximumf>, %23, %cst_15 [1] : vector<8x8xf32> to vector<8xf32>
    %25 = vector.shape_cast %24 : vector<8xf32> to vector<8x1xf32>
    %26 = vector.broadcast %25 : vector<8x1xf32> to vector<8x8xf32>
    %27 = arith.subf %23, %26 : vector<8x8xf32>
    %28 = math.exp %27 : vector<8x8xf32>
    %cst_16 = arith.constant dense<0.000000e+00> : vector<8xf32>
    %29 = vector.multi_reduction <add>, %28, %cst_16 [1] : vector<8x8xf32> to vector<8xf32>
    %30 = vector.shape_cast %29 : vector<8xf32> to vector<8x1xf32>
    %31 = tpu.reciprocal %30 : vector<8x1xf32> -> vector<8x1xf32>
    %32 = vector.broadcast %31 : vector<8x1xf32> to vector<8x8xf32>
    %33 = arith.mulf %28, %32 : vector<8x8xf32>
    %cst_17 = arith.constant dense<0.000000e+00> : vector<8x32xf32>
    %34 = tpu.matmul %33, %18, %cst_17 {dimension_numbers = #tpu.dot_dimension_numbers<[1], [0], [0], [1], [0, 0, 1, 1], [], []>} : vector<8x8xf32>, vector<8x32xf32>, vector<8x32xf32> -> vector<8x32xf32>
    %35 = vector.extract_strided_slice %15 {offsets = [0, 32], sizes = [8, 32], strides = [1, 1]} : vector<8x64xf32> to vector<8x32xf32>
    %36 = vector.extract_strided_slice %10 {offsets = [0, 32], sizes = [8, 32], strides = [1, 1]} : vector<8x64xf32> to vector<8x32xf32>
    %37 = vector.extract_strided_slice %11 {offsets = [0, 32], sizes = [8, 32], strides = [1, 1]} : vector<8x64xf32> to vector<8x32xf32>
    %cst_18 = arith.constant dense<0.000000e+00> : vector<8x8xf32>
    %38 = tpu.matmul %35, %36, %cst_18 {dimension_numbers = #tpu.dot_dimension_numbers<[1], [1], [0], [0], [0, 0, 1, 0], [], []>} : vector<8x32xf32>, vector<8x32xf32>, vector<8x8xf32> -> vector<8x8xf32>
    %cst_19 = arith.constant 0.000000e+00 : f32
    %39 = vector.broadcast %cst_19 : f32 to vector<8x8xf32>
    %40 = arith.cmpf one, %38, %39 : vector<8x8xf32>
    %cst_20 = arith.constant -9.000000e+15 : f32
    %41 = vector.broadcast %cst_20 : f32 to vector<8x8xf32>
    %42 = arith.select %40, %38, %41 : vector<8x8xi1>, vector<8x8xf32>
    %cst_21 = arith.constant dense<0xFF800000> : vector<8xf32>
    %43 = vector.multi_reduction <maximumf>, %42, %cst_21 [1] : vector<8x8xf32> to vector<8xf32>
    %44 = vector.shape_cast %43 : vector<8xf32> to vector<8x1xf32>
    %45 = vector.broadcast %44 : vector<8x1xf32> to vector<8x8xf32>
    %46 = arith.subf %42, %45 : vector<8x8xf32>
    %47 = math.exp %46 : vector<8x8xf32>
    %cst_22 = arith.constant dense<0.000000e+00> : vector<8xf32>
    %48 = vector.multi_reduction <add>, %47, %cst_22 [1] : vector<8x8xf32> to vector<8xf32>
    %49 = vector.shape_cast %48 : vector<8xf32> to vector<8x1xf32>
    %50 = tpu.reciprocal %49 : vector<8x1xf32> -> vector<8x1xf32>
    %51 = vector.broadcast %50 : vector<8x1xf32> to vector<8x8xf32>
    %52 = arith.mulf %47, %51 : vector<8x8xf32>
    %cst_23 = arith.constant dense<0.000000e+00> : vector<8x32xf32>
    %53 = tpu.matmul %52, %37, %cst_23 {dimension_numbers = #tpu.dot_dimension_numbers<[1], [0], [0], [1], [0, 0, 1, 1], [], []>} : vector<8x8xf32>, vector<8x32xf32>, vector<8x32xf32> -> vector<8x32xf32>
    %54 = tpu.concatenate %34, %53 in 1 : vector<8x32xf32>, vector<8x32xf32> -> vector<8x64xf32>
    %cst_24 = arith.constant dense<0.000000e+00> : vector<8x32xf32>
    %55 = tpu.matmul %54, %13, %cst_24 {dimension_numbers = #tpu.dot_dimension_numbers<[1], [0], [0], [1], [0, 0, 1, 1], [], []>} : vector<8x64xf32>, vector<64x32xf32>, vector<8x32xf32> -> vector<8x32xf32>
    %56 = arith.addf %55, %3 : vector<8x32xf32>
    %57 = vector.extract_strided_slice %5 {offsets = [0, 0], sizes = [1, 32], strides = [1, 1]} : vector<6x32xf32> to vector<1x32xf32>
    %58 = vector.extract_strided_slice %5 {offsets = [1, 0], sizes = [1, 32], strides = [1, 1]} : vector<6x32xf32> to vector<1x32xf32>
    %cst_25 = arith.constant dense<0.000000e+00> : vector<8xf32>
    %59 = vector.multi_reduction <add>, %56, %cst_25 [1] : vector<8x32xf32> to vector<8xf32>
    %60 = vector.shape_cast %59 : vector<8xf32> to vector<8x1xf32>
    %cst_26 = arith.constant 3.200000e+01 : f32
    %61 = vector.broadcast %cst_26 : f32 to vector<8x1xf32>
    %62 = arith.divf %60, %61 : vector<8x1xf32>
    %63 = vector.broadcast %62 : vector<8x1xf32> to vector<8x32xf32>
    %64 = arith.subf %56, %63 : vector<8x32xf32>
    %65 = arith.mulf %64, %64 : vector<8x32xf32>
    %cst_27 = arith.constant dense<0.000000e+00> : vector<8xf32>
    %66 = vector.multi_reduction <add>, %65, %cst_27 [1] : vector<8x32xf32> to vector<8xf32>
    %67 = vector.shape_cast %66 : vector<8xf32> to vector<8x1xf32>
    %cst_28 = arith.constant 3.200000e+01 : f32
    %68 = vector.broadcast %cst_28 : f32 to vector<8x1xf32>
    %69 = arith.divf %67, %68 : vector<8x1xf32>
    %70 = vector.broadcast %62 : vector<8x1xf32> to vector<8x32xf32>
    %71 = arith.subf %56, %70 : vector<8x32xf32>
    %cst_29 = arith.constant 9.99999974E-6 : f32
    %72 = vector.broadcast %cst_29 : f32 to vector<8x1xf32>
    %73 = arith.addf %69, %72 : vector<8x1xf32>
    %74 = math.rsqrt %73 : vector<8x1xf32>
    %75 = vector.broadcast %74 : vector<8x1xf32> to vector<8x32xf32>
    %76 = arith.mulf %71, %75 : vector<8x32xf32>
    %77 = vector.broadcast %57 : vector<1x32xf32> to vector<8x32xf32>
    %78 = arith.mulf %76, %77 : vector<8x32xf32>
    %79 = vector.broadcast %58 : vector<1x32xf32> to vector<8x32xf32>
    %80 = arith.addf %78, %79 : vector<8x32xf32>
    %c0_30 = arith.constant 0 : index
    %c0_31 = arith.constant 0 : index
    %c0_32 = arith.constant 0 : index
    %81 = vector.load %arg3[%c0_30, %c0_31, %c0_32] : memref<1x8x32xf32, #tpu.memory_space<vmem>>, vector<1x8x32xf32>
    %82 = vector.shape_cast %81 : vector<1x8x32xf32> to vector<8x32xf32>
    %c0_33 = arith.constant 0 : index
    %c0_34 = arith.constant 0 : index
    %c0_35 = arith.constant 0 : index
    %83 = vector.load %arg6[%c0_33, %c0_34, %c0_35] : memref<1x32x64xf32, #tpu.memory_space<vmem>>, vector<1x32x64xf32>
    %84 = vector.shape_cast %83 : vector<1x32x64xf32> to vector<32x64xf32>
    %cst_36 = arith.constant dense<0.000000e+00> : vector<8x64xf32>
    %85 = tpu.matmul %80, %84, %cst_36 {dimension_numbers = #tpu.dot_dimension_numbers<[1], [0], [0], [1], [0, 0, 1, 1], [], []>} : vector<8x32xf32>, vector<32x64xf32>, vector<8x64xf32> -> vector<8x64xf32>
    %c0_37 = arith.constant 0 : index
    %c0_38 = arith.constant 0 : index
    %c0_39 = arith.constant 0 : index
    %86 = vector.load %arg7[%c0_37, %c0_38, %c0_39] : memref<1x32x128xf32, #tpu.memory_space<vmem>>, vector<1x32x128xf32>
    %87 = vector.shape_cast %86 : vector<1x32x128xf32> to vector<32x128xf32>
    %cst_40 = arith.constant dense<0.000000e+00> : vector<8x128xf32>
    %88 = tpu.matmul %82, %87, %cst_40 {dimension_numbers = #tpu.dot_dimension_numbers<[1], [0], [0], [1], [0, 0, 1, 1], [], []>} : vector<8x32xf32>, vector<32x128xf32>, vector<8x128xf32> -> vector<8x128xf32>
    %89 = vector.extract_strided_slice %88 {offsets = [0, 0], sizes = [8, 64], strides = [1, 1]} : vector<8x128xf32> to vector<8x64xf32>
    %90 = vector.extract_strided_slice %88 {offsets = [0, 64], sizes = [8, 64], strides = [1, 1]} : vector<8x128xf32> to vector<8x64xf32>
    %c0_41 = arith.constant 0 : index
    %c0_42 = arith.constant 0 : index
    %c0_43 = arith.constant 0 : index
    %91 = vector.load %arg8[%c0_41, %c0_42, %c0_43] : memref<1x64x32xf32, #tpu.memory_space<vmem>>, vector<1x64x32xf32>
    %92 = vector.shape_cast %91 : vector<1x64x32xf32> to vector<64x32xf32>
    %cst_44 = arith.constant 0.353553385 : f32
    %93 = vector.broadcast %cst_44 : f32 to vector<8x64xf32>
    %94 = arith.mulf %85, %93 : vector<8x64xf32>
    %95 = vector.extract_strided_slice %94 {offsets = [0, 0], sizes = [8, 32], strides = [1, 1]} : vector<8x64xf32> to vector<8x32xf32>
    %96 = vector.extract_strided_slice %89 {offsets = [0, 0], sizes = [8, 32], strides = [1, 1]} : vector<8x64xf32> to vector<8x32xf32>
    %97 = vector.extract_strided_slice %90 {offsets = [0, 0], sizes = [8, 32], strides = [1, 1]} : vector<8x64xf32> to vector<8x32xf32>
    %cst_45 = arith.constant dense<0.000000e+00> : vector<8x8xf32>
    %98 = tpu.matmul %95, %96, %cst_45 {dimension_numbers = #tpu.dot_dimension_numbers<[1], [1], [0], [0], [0, 0, 1, 0], [], []>} : vector<8x32xf32>, vector<8x32xf32>, vector<8x8xf32> -> vector<8x8xf32>
    %cst_46 = arith.constant 0.000000e+00 : f32
    %99 = vector.broadcast %cst_46 : f32 to vector<8x8xf32>
    %100 = arith.cmpf one, %98, %99 : vector<8x8xf32>
    %cst_47 = arith.constant -9.000000e+15 : f32
    %101 = vector.broadcast %cst_47 : f32 to vector<8x8xf32>
    %102 = arith.select %100, %98, %101 : vector<8x8xi1>, vector<8x8xf32>
    %cst_48 = arith.constant dense<0xFF800000> : vector<8xf32>
    %103 = vector.multi_reduction <maximumf>, %102, %cst_48 [1] : vector<8x8xf32> to vector<8xf32>
    %104 = vector.shape_cast %103 : vector<8xf32> to vector<8x1xf32>
    %105 = vector.broadcast %104 : vector<8x1xf32> to vector<8x8xf32>
    %106 = arith.subf %102, %105 : vector<8x8xf32>
    %107 = math.exp %106 : vector<8x8xf32>
    %cst_49 = arith.constant dense<0.000000e+00> : vector<8xf32>
    %108 = vector.multi_reduction <add>, %107, %cst_49 [1] : vector<8x8xf32> to vector<8xf32>
    %109 = vector.shape_cast %108 : vector<8xf32> to vector<8x1xf32>
    %110 = tpu.reciprocal %109 : vector<8x1xf32> -> vector<8x1xf32>
    %111 = vector.broadcast %110 : vector<8x1xf32> to vector<8x8xf32>
    %112 = arith.mulf %107, %111 : vector<8x8xf32>
    %cst_50 = arith.constant dense<0.000000e+00> : vector<8x32xf32>
    %113 = tpu.matmul %112, %97, %cst_50 {dimension_numbers = #tpu.dot_dimension_numbers<[1], [0], [0], [1], [0, 0, 1, 1], [], []>} : vector<8x8xf32>, vector<8x32xf32>, vector<8x32xf32> -> vector<8x32xf32>
    %114 = vector.extract_strided_slice %94 {offsets = [0, 32], sizes = [8, 32], strides = [1, 1]} : vector<8x64xf32> to vector<8x32xf32>
    %115 = vector.extract_strided_slice %89 {offsets = [0, 32], sizes = [8, 32], strides = [1, 1]} : vector<8x64xf32> to vector<8x32xf32>
    %116 = vector.extract_strided_slice %90 {offsets = [0, 32], sizes = [8, 32], strides = [1, 1]} : vector<8x64xf32> to vector<8x32xf32>
    %cst_51 = arith.constant dense<0.000000e+00> : vector<8x8xf32>
    %117 = tpu.matmul %114, %115, %cst_51 {dimension_numbers = #tpu.dot_dimension_numbers<[1], [1], [0], [0], [0, 0, 1, 0], [], []>} : vector<8x32xf32>, vector<8x32xf32>, vector<8x8xf32> -> vector<8x8xf32>
    %cst_52 = arith.constant 0.000000e+00 : f32
    %118 = vector.broadcast %cst_52 : f32 to vector<8x8xf32>
    %119 = arith.cmpf one, %117, %118 : vector<8x8xf32>
    %cst_53 = arith.constant -9.000000e+15 : f32
    %120 = vector.broadcast %cst_53 : f32 to vector<8x8xf32>
    %121 = arith.select %119, %117, %120 : vector<8x8xi1>, vector<8x8xf32>
    %cst_54 = arith.constant dense<0xFF800000> : vector<8xf32>
    %122 = vector.multi_reduction <maximumf>, %121, %cst_54 [1] : vector<8x8xf32> to vector<8xf32>
    %123 = vector.shape_cast %122 : vector<8xf32> to vector<8x1xf32>
    %124 = vector.broadcast %123 : vector<8x1xf32> to vector<8x8xf32>
    %125 = arith.subf %121, %124 : vector<8x8xf32>
    %126 = math.exp %125 : vector<8x8xf32>
    %cst_55 = arith.constant dense<0.000000e+00> : vector<8xf32>
    %127 = vector.multi_reduction <add>, %126, %cst_55 [1] : vector<8x8xf32> to vector<8xf32>
    %128 = vector.shape_cast %127 : vector<8xf32> to vector<8x1xf32>
    %129 = tpu.reciprocal %128 : vector<8x1xf32> -> vector<8x1xf32>
    %130 = vector.broadcast %129 : vector<8x1xf32> to vector<8x8xf32>
    %131 = arith.mulf %126, %130 : vector<8x8xf32>
    %cst_56 = arith.constant dense<0.000000e+00> : vector<8x32xf32>
    %132 = tpu.matmul %131, %116, %cst_56 {dimension_numbers = #tpu.dot_dimension_numbers<[1], [0], [0], [1], [0, 0, 1, 1], [], []>} : vector<8x8xf32>, vector<8x32xf32>, vector<8x32xf32> -> vector<8x32xf32>
    %133 = tpu.concatenate %113, %132 in 1 : vector<8x32xf32>, vector<8x32xf32> -> vector<8x64xf32>
    %cst_57 = arith.constant dense<0.000000e+00> : vector<8x32xf32>
    %134 = tpu.matmul %133, %92, %cst_57 {dimension_numbers = #tpu.dot_dimension_numbers<[1], [0], [0], [1], [0, 0, 1, 1], [], []>} : vector<8x64xf32>, vector<64x32xf32>, vector<8x32xf32> -> vector<8x32xf32>
    %135 = arith.addf %134, %80 : vector<8x32xf32>
    %136 = vector.extract_strided_slice %5 {offsets = [2, 0], sizes = [1, 32], strides = [1, 1]} : vector<6x32xf32> to vector<1x32xf32>
    %137 = vector.extract_strided_slice %5 {offsets = [3, 0], sizes = [1, 32], strides = [1, 1]} : vector<6x32xf32> to vector<1x32xf32>
    %cst_58 = arith.constant dense<0.000000e+00> : vector<8xf32>
    %138 = vector.multi_reduction <add>, %135, %cst_58 [1] : vector<8x32xf32> to vector<8xf32>
    %139 = vector.shape_cast %138 : vector<8xf32> to vector<8x1xf32>
    %cst_59 = arith.constant 3.200000e+01 : f32
    %140 = vector.broadcast %cst_59 : f32 to vector<8x1xf32>
    %141 = arith.divf %139, %140 : vector<8x1xf32>
    %142 = vector.broadcast %141 : vector<8x1xf32> to vector<8x32xf32>
    %143 = arith.subf %135, %142 : vector<8x32xf32>
    %144 = arith.mulf %143, %143 : vector<8x32xf32>
    %cst_60 = arith.constant dense<0.000000e+00> : vector<8xf32>
    %145 = vector.multi_reduction <add>, %144, %cst_60 [1] : vector<8x32xf32> to vector<8xf32>
    %146 = vector.shape_cast %145 : vector<8xf32> to vector<8x1xf32>
    %cst_61 = arith.constant 3.200000e+01 : f32
    %147 = vector.broadcast %cst_61 : f32 to vector<8x1xf32>
    %148 = arith.divf %146, %147 : vector<8x1xf32>
    %149 = vector.broadcast %141 : vector<8x1xf32> to vector<8x32xf32>
    %150 = arith.subf %135, %149 : vector<8x32xf32>
    %cst_62 = arith.constant 9.99999974E-6 : f32
    %151 = vector.broadcast %cst_62 : f32 to vector<8x1xf32>
    %152 = arith.addf %148, %151 : vector<8x1xf32>
    %153 = math.rsqrt %152 : vector<8x1xf32>
    %154 = vector.broadcast %153 : vector<8x1xf32> to vector<8x32xf32>
    %155 = arith.mulf %150, %154 : vector<8x32xf32>
    %156 = vector.broadcast %136 : vector<1x32xf32> to vector<8x32xf32>
    %157 = arith.mulf %155, %156 : vector<8x32xf32>
    %158 = vector.broadcast %137 : vector<1x32xf32> to vector<8x32xf32>
    %159 = arith.addf %157, %158 : vector<8x32xf32>
    %c0_63 = arith.constant 0 : index
    %c0_64 = arith.constant 0 : index
    %c0_65 = arith.constant 0 : index
    %160 = vector.load %arg9[%c0_63, %c0_64, %c0_65] : memref<1x32x64xf32, #tpu.memory_space<vmem>>, vector<1x32x64xf32>
    %161 = vector.shape_cast %160 : vector<1x32x64xf32> to vector<32x64xf32>
    %cst_66 = arith.constant dense<0.000000e+00> : vector<8x64xf32>
    %162 = tpu.matmul %159, %161, %cst_66 {dimension_numbers = #tpu.dot_dimension_numbers<[1], [0], [0], [1], [0, 0, 1, 1], [], []>} : vector<8x32xf32>, vector<32x64xf32>, vector<8x64xf32> -> vector<8x64xf32>
    %c0_67 = arith.constant 0 : index
    %c0_68 = arith.constant 0 : index
    %c0_69 = arith.constant 0 : index
    %163 = vector.load %arg10[%c0_67, %c0_68, %c0_69] : memref<1x1x64xf32, #tpu.memory_space<vmem>>, vector<1x1x64xf32>
    %164 = vector.shape_cast %163 : vector<1x1x64xf32> to vector<1x64xf32>
    %165 = vector.broadcast %164 : vector<1x64xf32> to vector<8x64xf32>
    %166 = arith.addf %162, %165 : vector<8x64xf32>
    %cst_70 = arith.constant 0.000000e+00 : f32
    %167 = vector.broadcast %cst_70 : f32 to vector<8x64xf32>
    %168 = arith.maximumf %166, %167 : vector<8x64xf32>
    %c0_71 = arith.constant 0 : index
    %c0_72 = arith.constant 0 : index
    %c0_73 = arith.constant 0 : index
    %169 = vector.load %arg11[%c0_71, %c0_72, %c0_73] : memref<1x64x32xf32, #tpu.memory_space<vmem>>, vector<1x64x32xf32>
    %170 = vector.shape_cast %169 : vector<1x64x32xf32> to vector<64x32xf32>
    %cst_74 = arith.constant dense<0.000000e+00> : vector<8x32xf32>
    %171 = tpu.matmul %168, %170, %cst_74 {dimension_numbers = #tpu.dot_dimension_numbers<[1], [0], [0], [1], [0, 0, 1, 1], [], []>} : vector<8x64xf32>, vector<64x32xf32>, vector<8x32xf32> -> vector<8x32xf32>
    %c0_75 = arith.constant 0 : index
    %c0_76 = arith.constant 0 : index
    %c0_77 = arith.constant 0 : index
    %172 = vector.load %arg12[%c0_75, %c0_76, %c0_77] : memref<1x1x32xf32, #tpu.memory_space<vmem>>, vector<1x1x32xf32>
    %173 = vector.shape_cast %172 : vector<1x1x32xf32> to vector<1x32xf32>
    %174 = vector.broadcast %173 : vector<1x32xf32> to vector<8x32xf32>
    %175 = arith.addf %171, %174 : vector<8x32xf32>
    %176 = arith.addf %175, %159 : vector<8x32xf32>
    %177 = vector.extract_strided_slice %5 {offsets = [4, 0], sizes = [1, 32], strides = [1, 1]} : vector<6x32xf32> to vector<1x32xf32>
    %178 = vector.extract_strided_slice %5 {offsets = [5, 0], sizes = [1, 32], strides = [1, 1]} : vector<6x32xf32> to vector<1x32xf32>
    %cst_78 = arith.constant dense<0.000000e+00> : vector<8xf32>
    %179 = vector.multi_reduction <add>, %176, %cst_78 [1] : vector<8x32xf32> to vector<8xf32>
    %180 = vector.shape_cast %179 : vector<8xf32> to vector<8x1xf32>
    %cst_79 = arith.constant 3.200000e+01 : f32
    %181 = vector.broadcast %cst_79 : f32 to vector<8x1xf32>
    %182 = arith.divf %180, %181 : vector<8x1xf32>
    %183 = vector.broadcast %182 : vector<8x1xf32> to vector<8x32xf32>
    %184 = arith.subf %176, %183 : vector<8x32xf32>
    %185 = arith.mulf %184, %184 : vector<8x32xf32>
    %cst_80 = arith.constant dense<0.000000e+00> : vector<8xf32>
    %186 = vector.multi_reduction <add>, %185, %cst_80 [1] : vector<8x32xf32> to vector<8xf32>
    %187 = vector.shape_cast %186 : vector<8xf32> to vector<8x1xf32>
    %cst_81 = arith.constant 3.200000e+01 : f32
    %188 = vector.broadcast %cst_81 : f32 to vector<8x1xf32>
    %189 = arith.divf %187, %188 : vector<8x1xf32>
    %190 = vector.broadcast %182 : vector<8x1xf32> to vector<8x32xf32>
    %191 = arith.subf %176, %190 : vector<8x32xf32>
    %cst_82 = arith.constant 9.99999974E-6 : f32
    %192 = vector.broadcast %cst_82 : f32 to vector<8x1xf32>
    %193 = arith.addf %189, %192 : vector<8x1xf32>
    %194 = math.rsqrt %193 : vector<8x1xf32>
    %195 = vector.broadcast %194 : vector<8x1xf32> to vector<8x32xf32>
    %196 = arith.mulf %191, %195 : vector<8x32xf32>
    %197 = vector.broadcast %177 : vector<1x32xf32> to vector<8x32xf32>
    %198 = arith.mulf %196, %197 : vector<8x32xf32>
    %199 = vector.broadcast %178 : vector<1x32xf32> to vector<8x32xf32>
    %200 = arith.addf %198, %199 : vector<8x32xf32>
    %c0_83 = arith.constant 0 : index
    %c0_84 = arith.constant 0 : index
    %201 = vector.load %arg15[%c0_83, %c0_84] : memref<8x32xf32, #tpu.memory_space<vmem>>, vector<8x32xf32>
    tpu.vector_store %arg15[%c0_83, %c0_84], %200 {strides = array<i32>} : memref<8x32xf32, #tpu.memory_space<vmem>>, vector<8x32xf32>,
    %c1_i32 = arith.constant 1 : i32
    %202 = arith.cmpi eq, %arg1, %c1_i32 : i32
    %203 = arith.extui %202 : i1 to i32
    %c0_i32_85 = arith.constant 0 : i32
    %204 = arith.cmpi ne, %203, %c0_i32_85 : i32
    scf.if %204 {
      %c0_86 = arith.constant 0 : index
      %c0_87 = arith.constant 0 : index
      %c0_88 = arith.constant 0 : index
      %205 = vector.load %arg14[%c0_86, %c0_87, %c0_88] : memref<1x8x32xf32, #tpu.memory_space<vmem>>, vector<1x8x32xf32>
      %206 = vector.shape_cast %205 : vector<1x8x32xf32> to vector<8x32xf32>
      %207 = vector.shape_cast %200 : vector<8x32xf32> to vector<1x8x32xf32>
      tpu.vector_store %arg14[%c0_86, %c0_87, %c0_88], %207 {strides = array<i32>} : memref<1x8x32xf32, #tpu.memory_space<vmem>>, vector<1x8x32xf32>,
    } else {
    }
    return
  }
  func.func @transform_0(%arg0: i32, %arg1: i32) -> (i32, i32, i32) {
    %c0_i32 = arith.constant 0 : i32
    %c0_i32_0 = arith.constant 0 : i32
    %c0_i32_1 = arith.constant 0 : i32
    return %arg0, %c0_i32, %c0_i32_0 : i32, i32, i32
  }
  func.func @transform_1(%arg0: i32, %arg1: i32) -> (i32, i32, i32) {
    %c0_i32 = arith.constant 0 : i32
    %c0_i32_0 = arith.constant 0 : i32
    %c0_i32_1 = arith.constant 0 : i32
    return %arg0, %c0_i32, %c0_i32_0 : i32, i32, i32
  }
  func.func @transform_2(%arg0: i32, %arg1: i32) -> (i32, i32, i32) {
    %c0_i32 = arith.constant 0 : i32
    %c0_i32_0 = arith.constant 0 : i32
    %c0_i32_1 = arith.constant 0 : i32
    return %arg1, %c0_i32, %c0_i32_0 : i32, i32, i32
  }
  func.func @transform_3(%arg0: i32, %arg1: i32) -> (i32, i32, i32) {
    %c0_i32 = arith.constant 0 : i32
    %c0_i32_0 = arith.constant 0 : i32
    %c0_i32_1 = arith.constant 0 : i32
    return %arg1, %c0_i32, %c0_i32_0 : i32, i32, i32
  }
  func.func @transform_4(%arg0: i32, %arg1: i32) -> (i32, i32, i32) {
    %c0_i32 = arith.constant 0 : i32
    %c0_i32_0 = arith.constant 0 : i32
    %c0_i32_1 = arith.constant 0 : i32
    return %arg1, %c0_i32, %c0_i32_0 : i32, i32, i32
  }
  func.func @transform_5(%arg0: i32, %arg1: i32) -> (i32, i32, i32) {
    %c0_i32 = arith.constant 0 : i32
    %c0_i32_0 = arith.constant 0 : i32
    %c0_i32_1 = arith.constant 0 : i32
    return %arg1, %c0_i32, %c0_i32_0 : i32, i32, i32
  }
  func.func @transform_6(%arg0: i32, %arg1: i32) -> (i32, i32, i32) {
    %c0_i32 = arith.constant 0 : i32
    %c0_i32_0 = arith.constant 0 : i32
    %c0_i32_1 = arith.constant 0 : i32
    return %arg1, %c0_i32, %c0_i32_0 : i32, i32, i32
  }
  func.func @transform_7(%arg0: i32, %arg1: i32) -> (i32, i32, i32) {
    %c0_i32 = arith.constant 0 : i32
    %c0_i32_0 = arith.constant 0 : i32
    %c0_i32_1 = arith.constant 0 : i32
    return %arg1, %c0_i32, %c0_i32_0 : i32, i32, i32
  }
  func.func @transform_8(%arg0: i32, %arg1: i32) -> (i32, i32, i32) {
    %c0_i32 = arith.constant 0 : i32
    %c0_i32_0 = arith.constant 0 : i32
    %c0_i32_1 = arith.constant 0 : i32
    return %arg1, %c0_i32, %c0_i32_0 : i32, i32, i32
  }
  func.func @transform_9(%arg0: i32, %arg1: i32) -> (i32, i32, i32) {
    %c0_i32 = arith.constant 0 : i32
    %c0_i32_0 = arith.constant 0 : i32
    %c0_i32_1 = arith.constant 0 : i32
    return %arg1, %c0_i32, %c0_i32_0 : i32, i32, i32
  }
  func.func @transform_10(%arg0: i32, %arg1: i32) -> (i32, i32, i32) {
    %c0_i32 = arith.constant 0 : i32
    %c0_i32_0 = arith.constant 0 : i32
    %c0_i32_1 = arith.constant 0 : i32
    return %arg1, %c0_i32, %c0_i32_0 : i32, i32, i32
  }
  func.func @transform_11(%arg0: i32, %arg1: i32) -> (i32, i32, i32) {
    %c0_i32 = arith.constant 0 : i32
    %c0_i32_0 = arith.constant 0 : i32
    %c0_i32_1 = arith.constant 0 : i32
    return %arg1, %c0_i32, %c0_i32_0 : i32, i32, i32
  }
  func.func @transform_12(%arg0: i32, %arg1: i32) -> (i32, i32, i32) {
    %c0_i32 = arith.constant 0 : i32
    %c0_i32_0 = arith.constant 0 : i32
    %c0_i32_1 = arith.constant 0 : i32
    return %arg0, %c0_i32, %c0_i32_0 : i32, i32, i32
  }
}

</mosaic_0001>

<bundles_post_ra>
// kernel: tpu_custom_call.1
= control target key start
LH: loop header
LB: loop body
LE: loop exit
PB: predicated region body
PF: predicated region fallthrough
CT: control target
= control target key end

     0   :  { %s2143_s0 = inlined_call_operand.vmem [shape: f32[2,8,32], index: 0, kind: input, shape index: {}]   ;;  %s2144_s1 = inlined_call_operand.vmem [shape: f32[2,8,32], index: 1, kind: input, shape index: {}]   ;;  %s2145_s2 = inlined_call_operand.vmem [shape: f32[2,32,192], index: 2, kind: input, shape index: {}]   ;;  %s2146_s3 = inlined_call_operand.vmem [shape: f32[2,64,32], index: 3, kind: input, shape index: {}]   ;;  %s2147_s4 = inlined_call_operand.vmem [shape: f32[2,32,64], index: 4, kind: input, shape index: {}]   ;;  %s2148_s5 = inlined_call_operand.vmem [shape: f32[2,32,128], index: 5, kind: input, shape index: {}]   ;;  %s2149_s6 = inlined_call_operand.vmem [shape: f32[2,64,32], index: 6, kind: input, shape index: {}]   ;;  %s2150_s7 = inlined_call_operand.vmem [shape: f32[2,32,64], index: 7, kind: input, shape index: {}]   ;;  %s2151_s8 = inlined_call_operand.vmem [shape: f32[2,1,64], index: 8, kind: input, shape index: {}]   ;;  %s2152_s9 = inlined_call_operand.vmem [shape: f32[2,64,32], index: 9, kind: input, shape index: {}]   ;;  %s2153_s10 = inlined_call_operand.vmem [shape: f32[2,1,32], index: 10, kind: input, shape index: {}]   ;;  %s2154_s11 = inlined_call_operand.vmem [shape: f32[2,6,32], index: 11, kind: input, shape index: {}]   ;;  %s2155_s12 = inlined_call_operand.hbm [shape: f32[2,8,32], index: 12, kind: output, shape index: {}]  }
   0x1   :  { %2171 = sst [smem:[#allocation19_spill]] %s2143_s0 }
   0x2   :  { %2172 = sst [smem:[#allocation20_spill]] %s2144_s1 }
   0x3   :  { %2173 = sst [smem:[#allocation21_spill]] %s2145_s2 }
   0x4   :  { %2174 = sst [smem:[#allocation22_spill]] %s2146_s3 }
   0x5   :  { %2175 = sst [smem:[#allocation23_spill]] %s2147_s4 }
   0x6   :  { %2176 = sst [smem:[#allocation24_spill]] %s2148_s5 }
   0x7   :  { %2177 = sst [smem:[#allocation25_spill]] %s2149_s6 }
   0x8   :  { %2178 = sst [smem:[#allocation26_spill]] %s2155_s12 }
   0x9   :  { %17 = vsyncpa [#allocation4], 0 }
   0xa   :  { %19 = vsyncpa [#allocation4 + $0x1], 0  ;;  %s1824_s21 = smov 0   ;;  %s1826_s22 = smov 0  }
   0xb   :  { %s1828_s23 = smov 0   ;;  %s1830_s24 = smov 0  }
   0xc   :  { %s1832_s25 = smov 0   ;;  %s1834_s26 = smov 0  }
   0xd   :  { %s1836_s27 = smov 0   ;;  %s1838_s28 = smov 0  }
   0xe LB: > { %2179 = sst [smem:[#allocation6_spill]] %s1725_s21  ;;  %s1502_s29 = sadd.s32 4294967295, %s1753_s28   ;;  %s1753_s28 = sphi %s1838_s28, %s25_s28   ;;  %s1749_s27 = sphi %s1836_s27, %s2217_s27   ;;  %s1745_s26 = sphi %s1834_s26, %s2216_s26   ;;  %s1741_s25 = sphi %s1832_s25, %s2215_s25   ;;  %s1737_s24 = sphi %s1830_s24, %s2214_s24   ;;  %s1733_s23 = sphi %s1828_s23, %s2213_s23   ;;  %s1729_s22 = sphi %s1826_s22, %s2212_s22   ;;  %s1725_s21 = sphi %s1824_s21, %s2211_s21  }
   0xf   : > { %2180 = sst [smem:[#allocation7_spill]] %s1729_s22  ;;  %s1503_s30 = sadd.s32 4294967294, %s1753_s28  }
  0x10   : > { %2181 = sst [smem:[#allocation8_spill]] %s1733_s23  ;;  %s34_s13 = sadd.s32 1, %s1745_s26 }
  0x11   : > { %2182 = sst [smem:[#allocation9_spill]] %s1741_s25  ;;  %p35_p0 = scmp.ge.s32.totalorder %s34_s13, 2 }
  0x12   : > { %2183 = sst [smem:[#allocation10_spill]] %s1745_s26  ;;  %s37_s14 = sadd.s32 1, %s1749_s27 }
  0x13   : > { %2184 = sst [smem:[#allocation11_spill]] %s1749_s27  ;;  %p366_p1 = scmp.ne.s32.totalorder %s1733_s23, %s1729_s22 }
  0x14   : > { %2185 = sst [smem:[#allocation12_spill]] %s1753_s28  ;;  %p367_p2 = scmp.eq.s32.totalorder %s1502_s29, 3 }
  0x15   : > { %s2219_s13 = smov (%p35_p0, %s34_s13), 0  ;;  %s2221_s14 = smov (!%p35_p0, %s37_s14), %s1749_s27 }
  0x16   : > { %2186 = sst [smem:[#allocation13_spill]] %s2219_s13  ;;  %p1873_p3 = por %p367_p2, %p366_p1 }
  0x17   : > { %p372_p4 = scmp.ne.s32.totalorder %s1729_s22, %s1725_s21  ;;  %p39_p5 = scmp.ge.s32.totalorder %s2221_s14, 2 }
  0x18   : > { %s2187_s15 = scalar_select %p1873_p3, 1, 0 }
  0x19   : > { %p373_p6 = scmp.eq.s32.totalorder %s1503_s30, 3  ;;  %p1506_p7 = scmp.ge.s32.totalorder %s1753_s28, 1 }
  0x1a   : > { %2188 = sst [smem:[#allocation14_spill]] %s2187_s15  ;;  %p480_p8 = scmp.lt.s32.totalorder %s1753_s28, 5 }
  0x1b   : > { %s2223_s14 = smov (%p39_p5, %s2221_s14), 0  ;;  %p1883_p9 = por %p373_p6, %p372_p4 }
  0x1c   : > { %2189 = sst [smem:[#allocation15_spill]] %s2223_s14  ;;  %p481_p10 = pnand %p1506_p7, %p480_p8 }
  0x1d   : > { %s2190_s16 = scalar_select %p1883_p9, 1, 0 }
  0x1e   : > { %s353_s17 = ssub.s32 %s1749_s27, %s2223_s14  ;;  %s356_s18 = sadd.s32 1, %s1733_s23 }
  0x1f   : > { %2191 = sst [smem:[#allocation16_spill]] %s2190_s16  ;;  %p354_p11 = scmp.eq.s32.totalorder %s353_s17, 0 }
  0x20   : > { %484 = sbr.rel (%p481_p10) target bundleno = 3181 (0xc6d), region = 68 }
  0x21   : > { %s1891_s19 = scalar_select %p354_p11, %s1733_s23, %s356_s18  }
  0x23   : > { %2192 = sst [smem:[#allocation17_spill]] %s1891_s19 }
  0x25   : > { %s2159_s20 = sand.u32 1, %s1729_s22   ;;  %p570_p12 = scmp.lt.s32.totalorder %s1741_s25, 1 }
  0x26   : > { %s1897_s29 = sshll.u32 %s2159_s20, 3  ;;  %p578_p13 = scmp.lt.s32.totalorder %s1737_s24, 1 }
  0x27   : > { %s571_s30 = scalar_select %p570_p12, %s1741_s25, 1 }
  0x28   : > { %s1902_s13 = scalar_select %p578_p13, %s1737_s24, 1 }
  0x29   : > { %s1508_s17 = sshll.u32 %s571_s30, 3  ;;  %s2193_s0 = sld [smem:[#allocation19_spill]] }
  0x2a   : > { %s2194_s1 = sld [smem:[#allocation20_spill]]  ;;  %s1551_s23 = sshll.u32 %s1902_s13, 6 }
  0x2b   : > { %s1553_s16 = sshll.u32 %s1902_s13, 5  ;;  %s2195_s2 = sld [smem:[#allocation21_spill]] }
  0x2c   : > { %s2196_s3 = sld [smem:[#allocation22_spill]]  ;;  %s1942_s22 = scalar_lea.vmem %s2150_s7, %s1553_s16 }
  0x2d   : > { %s2197_s4 = sld [smem:[#allocation23_spill]]  ;;  %s610_s14 = scalar_lea.vmem %s2151_s8, %s1902_s13 }
  0x2e   : > { %s2198_s5 = sld [smem:[#allocation24_spill]]  ;;  %s1951_s26 = scalar_lea.vmem %s2152_s9, %s1551_s23 }
  0x2f   : > { %s573_s27 = scalar_lea.vmem %s2193_s0, %s1508_s17  ;;  %s2199_s6 = sld [smem:[#allocation25_spill]] }
  0x30   : > { %s1910_s20 = scalar_lea.vmem %s2194_s1, %s1508_s17  ;;  %s618_s1 = scalar_lea.vmem %s2153_s10, %s1902_s13 }
  0x31   : > { %s1917_s12 = scalar_lea.vmem %s2195_s2, %s1551_s23  ;;  %s1524_s25 = sshll.u32 %s1902_s13, 3 }
  0x32   : > { %s1922_s30 = scalar_lea.vmem %s2196_s3, %s1551_s23  ;;  %s1961_s2 = scalar_lea.vmem %s2154_s11, %s1524_s25 }
  0x33   : > { %s1927_s0 = scalar_lea.vmem %s2197_s4, %s1553_s16  ;;  %p1525_p0 = scmp.ne.s32.totalorder %s1737_s24, 0 }
  0x34   : > { %s1932_s17 = scalar_lea.vmem %s2198_s5, %s1553_s16  ;;  %s569_s16 = scalar_lea.vmem [#allocation3], %s1897_s29 }
  0x35   : > { %s1937_s21 = scalar_lea.vmem %s2199_s6, %s1551_s23  ;;  %626 = sbr.rel (%p1525_p0) target bundleno = 60 (0x3c), region = 72 }
  0x36   : > { %2200 = sst [smem:[#allocation18_spill]] %s1937_s21 }
  0x3a   : > { %v627_v0 = vld [vmem:[%s573_s27] sm:$0xff]  ;;  %vm628_vm0 = vcmask 261120  }
  0x3b   : > { %629 = vst.msk [vmem:[#allocation2] sm:$0xff] %vm628_vm0, %v627_v0 }
  0x3c PF: > { %v638_v1 = vld [vmem:[%s1917_s12 + $0x30] sm:$0xff]  ;;  %v636_v2 = vld [vmem:[%s1917_s12 + $0x20] sm:$0xff]  ;;  %vm640_vm1 = vcmask 261120   ;;  %s1755_s3 = smov 64   ;;  %s1756_s4 = smov 96   ;;  %v639_v11 = vld [vmem:[%s1917_s12 + $0x38] sm:$0xff] }
  0x3d   : > { %656 = vmatpush.msra.mxu0 %v638_v1  ;;  %v634_v3 = vld [vmem:[%s1917_s12 + $0x10] sm:$0xff]  ;;  %v632_v4 = vld [vmem:[%s1917_s12] sm:$0xff]  ;;  %s1757_s5 = smov 32   ;;  %v637_v12 = vld [vmem:[%s1917_s12 + $0x28] sm:$0xff]  ;;  %676 = vmatpush.msra.mxu1 %v639_v11  ;;  %vm723_vm2 = vcmask 64512   ;;  %vm857_vm13 = vcmask 523264  }
  0x3e   : > { %v635_v13 = vld [vmem:[%s1917_s12 + $0x18] sm:$0xff]  ;;  %v633_v14 = vld [vmem:[%s1917_s12 + $0x8] sm:$0xff]  ;;  %v690_v58 = vld [vmem:[%s1922_s30 + $0x30] sm:$0xff]  ;;  %p1546_p1 = scmp.ne.s32.totalorder %s1737_s24, 1 }
  0x3f   : > { %657 = vmatpush.msra.mxu0 %v636_v2  ;;  %677 = vmatpush.msra.mxu1 %v637_v12  ;;  %v691_v57 = vld [vmem:[%s1922_s30 + $0x38] sm:$0xff]  ;;  %v689_v59 = vld [vmem:[%s1922_s30 + $0x28] sm:$0xff]  ;;  %v688_v60 = vld [vmem:[%s1922_s30 + $0x20] sm:$0xff] }
  0x40   : > { %v687_v61 = vld [vmem:[%s1922_s30 + $0x18] sm:$0xff]  ;;  %v686_v62 = vld [vmem:[%s1922_s30 + $0x10] sm:$0xff]  ;;  %v685_v63 = vld [vmem:[%s1922_s30 + $0x8] sm:$0xff] }
  0x41   : > { %658 = vmatpush.msra.mxu0 %v634_v3  ;;  %678 = vmatpush.msra.mxu1 %v635_v13  ;;  %v684_v2 = vld [vmem:[%s1922_s30] sm:$0xff] }
  0x42   : > { %v1969_v5 = vld [vmem:[#allocation2] sm:$0xff] }
  0x43   : > { %659 = vmatpush.msra.mxu0 %v632_v4  ;;  %679 = vmatpush.msra.mxu1 %v633_v14 }
  0x44   : > { %1526 = vmatmul.msk.f32.vlgmr.msra.gmra.mxu0 %vm640_vm1, %v1969_v5  ;;  %1527 = vmatmul.msk.f32.vlgmr.msra.gmra.mxu1 %vm640_vm1, %v1969_v5 }
  0x45   : > { %869 = vmatpush.msrb.mxu0 %v691_v57 }
  0x47   : > { %870 = vmatpush.msrb.mxu0 %v690_v58 }
  0x49   : > { %871 = vmatpush.msrb.mxu0 %v689_v59 }
  0x4b   : > { %872 = vmatpush.msrb.mxu0 %v688_v60 }
  0x4d   : > { %873 = vmatpush.msrb.mxu0 %v687_v61 }
  0x4f   : > { %874 = vmatpush.msrb.mxu0 %v686_v62 }
  0x51   : > { %875 = vmatpush.msrb.mxu0 %v685_v63 }
  0x53   : > { %876 = vmatpush.msrb.mxu0 %v684_v2 }
  0xc1   : > { %v661_v6 = vpop.f32.mrf.mxu0  ;;  %v681_v21 = vpop.f32.mrf.mxu1 }
  0xc2   : > { %694 = vrot.lane.b32.xlu0 %v661_v6, %s1755_s3  ;;  %v692_v7 = vmul.f32 0.35355338, %v661_v6 }
  0xc4   : > { %771 = vrot.lane.b32.xlu1 %v692_v7, %s1756_s4 }
  0xca   : > { %773 = vrot.lane.b32.xlu0 %v661_v6, %s1757_s5 }
 0x134   : > { %v695_v8 = vpop.permute.xlu0 %694 }
 0x135   : > { %1528 = vmatpush.xpose.msk.msra.mxu2 %vm640_vm1, %v695_v8 }
 0x136   : > { %v772_v10 = vpop.permute.xlu1 %771 }
 0x138   : > { %1529 = vmatmul.msk.f32.vlgmr.msra.gmra.mxu2 %vm640_vm1, %v692_v7 }
 0x139   : > { %766 = vmatpush.msrb.mxu2 %v681_v21 }
 0x13c   : > { %v774_v9 = vpop.permute.xlu0 %773 }
 0x13d   : > { %1531 = vmatpush.xpose.msk.msra.mxu3 %vm640_vm1, %v774_v9  ;;  %v1758_v9 = vmov 32.0  }
 0x140   : > { %1532 = vmatmul.msk.f32.vlgmr.msra.gmra.mxu3 %vm640_vm1, %v772_v10 }
 0x1bb   : > { %v718_v15 = vpop.f32.mrf.mxu2 }
 0x1bc   : > { %vm721_vm3 = vcmp.ne.f32.partialorder %v718_v15, 0.0 }
 0x1bd   : > { %v722_v16 = vsel %vm721_vm3, %v718_v15, -9e+15 }
 0x1be   : > { %v724_v17 = vsel %vm723_vm2, %v722_v16, -inf }
 0x1bf   : > { %725 = vmax.xlane.f32.xlu1 %v724_v17 }
 0x1c3   : > { %v796_v18 = vpop.f32.mrf.mxu3 }
 0x1c4   : > { %vm799_vm4 = vcmp.ne.f32.partialorder %v796_v18, 0.0 }
 0x1c5   : > { %v800_v19 = vsel %vm799_vm4, %v796_v18, -9e+15 }
 0x1c6   : > { %v801_v20 = vsel %vm723_vm2, %v800_v19, -inf }
 0x1c7   : > { %802 = vmax.xlane.f32.xlu2 %v801_v20  ;;  %v945_v20 = vld [vmem:[%s1932_s17 + $0x18] sm:$0xff] }
 0x1c8   : > { %961 = vmatpush.msrb.mxu3 %v945_v20 }
 0x232   : > { %v726_v22 = vpop.xlane.xlu1 %725 }
 0x233   : > { %v727_v23 = vsub.f32 %v722_v16, %v726_v22  ;;  %v943_v22 = vld [vmem:[%s1932_s17 + $0x8] sm:$0xff] }
 0x235   : > { %v728_v24 = vmul.f32 1.442695, %v727_v23  ;;  %v942_v23 = vld [vmem:[%s1932_s17] sm:$0xff] }
 0x237   : > { %1635 = vpow2.f32 %v728_v24  ;;  %v914_v24 = vld [vmem:[%s1910_s20] sm:$0xff] }
 0x23a   : > { %v803_v25 = vpop.xlane.xlu2 %802 }
 0x23b   : > { %v804_v26 = vsub.f32 %v800_v19, %v803_v25  ;;  %v918_v25 = vld [vmem:[%s1927_s0 + $0x18] sm:$0xff] }
 0x23c   : > { %934 = vmatpush.msrb.mxu1 %v918_v25 }
 0x23d   : > { %v1636_v27 = vpop.eup %1635  ;;  %v805_v28 = vmul.f32 1.442695, %v804_v26  ;;  %v917_v26 = vld [vmem:[%s1927_s0 + $0x10] sm:$0xff] }
 0x23e   : > { %v730_v29 = vsel %vm723_vm2, %v1636_v27, 0.0  ;;  %935 = vmatpush.msrb.mxu1 %v917_v26 }
 0x23f   : > { %1637 = vpow2.f32 %v805_v28  ;;  %731 = vadd.xlane.f32.xlu2 %v730_v29  ;;  %v915_v28 = vld [vmem:[%s1927_s0] sm:$0xff] }
 0x245   : > { %v1638_v30 = vpop.eup %1637 }
 0x246   : > { %v807_v31 = vsel %vm723_vm2, %v1638_v30, 0.0 }
 0x247   : > { %808 = vadd.xlane.f32.xlu0 %v807_v31 }
 0x257   : > { %826 = vrot.lane.b32.xlu2 %v681_v21, %s1756_s4  ;;  %v944_v21 = vld [vmem:[%s1932_s17 + $0x10] sm:$0xff] }
 0x258   : > { %962 = vmatpush.msrb.mxu3 %v944_v21 }
 0x25a   : > { %963 = vmatpush.msrb.mxu3 %v943_v22 }
 0x25c   : > { %964 = vmatpush.msrb.mxu3 %v942_v23 }
 0x25d   : > { %1536 = vmatmul.msk.f32.vlgmr.msrb.gmra.mxu3 %vm640_vm1, %v914_v24 }
 0x2b2   : > { %v732_v32 = vpop.xlane.xlu2 %731 }
 0x2b3   : > { %1639 = vrcp.f32 %v732_v32  ;;  %v744_v38 = vand.u32 2147483648, %v732_v32  ;;  %v742_v40 = vand.u32 2147483647, %v732_v32  ;;  %vm738_vm6 = vweird.f32 %v732_v32 }
 0x2b5   : > { %v745_v43 = vor.u32 1.1754944e-38, %v744_v38  ;;  %vm743_vm8 = vcmp.eq.f32.partialorder %v742_v40, 8.507059e+37 }
 0x2b9   : > { %v1640_v33 = vpop.eup %1639 }
 0x2ba   : > { %v734_v34 = vmul.f32 %v1640_v33, %v732_v32  ;;  %v809_v35 = vpop.xlane.xlu0 %808  ;;  %v827_v36 = vpop.permute.xlu2 %826  ;;  %vm739_vm5 = vweird.f32 %v1640_v33 }
 0x2bb   : > { %1641 = vrcp.f32 %v809_v35  ;;  %847 = vmatpush.msra.mxu2 %v827_v36  ;;  %vm740_vm7 = vmor %vm738_vm6, %vm739_vm5  ;;  %v821_v49 = vand.u32 2147483648, %v809_v35  ;;  %v819_v51 = vand.u32 2147483647, %v809_v35  ;;  %vm815_vm10 = vweird.f32 %v809_v35 }
 0x2bc   : > { %v735_v37 = vsub.f32 1.0, %v734_v34  ;;  %1643 = vrcp.f32 %v1758_v9 }
 0x2bd   : > { %v822_v53 = vor.u32 1.1754944e-38, %v821_v49  ;;  %vm820_vm12 = vcmp.eq.f32.partialorder %v819_v51, 8.507059e+37 }
 0x2be   : > { %v736_v39 = vmul.f32 %v1640_v33, %v735_v37  ;;  %v2022_v37 = vld [vmem:[%s1961_s2] sm:$0x3f] }
 0x2c0   : > { %v737_v41 = vadd.f32 %v1640_v33, %v736_v39  ;;  %v910_v39 = vperm.slane %v2022_v37, 0 }
 0x2c1   : > { %v1642_v42 = vpop.eup %1641 }
 0x2c2   : > { %v811_v44 = vmul.f32 %v1642_v42, %v809_v35  ;;  %v741_v45 = vsel %vm740_vm7, %v1640_v33, %v737_v41  ;;  %vm816_vm9 = vweird.f32 %v1642_v42  ;;  %v1644_v10 = vpop.eup %1643 }
 0x2c3   : > { %v746_v46 = vsel %vm743_vm8, %v745_v43, %v741_v45  ;;  %vm817_vm11 = vmor %vm815_vm10, %vm816_vm9  ;;  %v885_v11 = vmul.f32 32.0, %v1644_v10  ;;  %vm889_vm14 = vweird.f32 %v1644_v10 }
 0x2c4   : > { %v812_v47 = vsub.f32 1.0, %v811_v44  ;;  %v747_v48 = vmul.f32 %v1636_v27, %v746_v46  ;;  %v916_v27 = vld [vmem:[%s1927_s0 + $0x8] sm:$0xff]  ;;  %s2201_s0 = sld [smem:[#allocation18_spill]] }
 0x2c5   : > { %v886_v12 = vsub.f32 1.0, %v885_v11  ;;  %936 = vmatpush.msrb.mxu1 %v916_v27 }
 0x2c6   : > { %v813_v50 = vmul.f32 %v1642_v42, %v812_v47  ;;  %1530 = vmatmul.msk.f32.vlgmr.msrb.gmra.mxu2 %vm723_vm2, %v747_v48 }
 0x2c7   : > { %v887_v13 = vmul.f32 %v1644_v10, %v886_v12  ;;  %937 = vmatpush.msrb.mxu1 %v915_v28 }
 0x2c8   : > { %v814_v52 = vadd.f32 %v1642_v42, %v813_v50 }
 0x2c9   : > { %v888_v14 = vadd.f32 %v1644_v10, %v887_v13 }
 0x2ca   : > { %v818_v54 = vsel %vm817_vm11, %v1642_v42, %v814_v52  ;;  %v912_v42 = vperm.slane %v2022_v37, 1 }
 0x2cb   : > { %v823_v55 = vsel %vm820_vm12, %v822_v53, %v818_v54  ;;  %v2006_v15 = vsel %vm889_vm14, %v1644_v10, %v888_v14 }
 0x2cc   : > { %v824_v56 = vmul.f32 %v1638_v30, %v823_v55 }
 0x2ce   : > { %1533 = vmatmul.msk.f32.vlgmr.msra.gmra.mxu2 %vm723_vm2, %v824_v56 }
 0x2e0   : > { %v966_v45 = vpop.f32.mrf.mxu3 }
 0x2e1   : > { %1058 = vrot.lane.b32.xlu0 %v966_v45, %s1756_s4  ;;  %1537 = vmatpush.xpose.msk.msrb.mxu2 %vm640_vm1, %v966_v45 }
 0x349   : > { %v768_v0 = vpop.f32.mrf.mxu2 }
 0x351   : > { %v849_v1 = vpop.f32.mrf.mxu2 }
 0x352   : > { %853 = vrot.lane.b32.xlu2 %v849_v1, %s1757_s5 }
 0x353   : > { %v1059_v48 = vpop.permute.xlu0 %1058 }
 0x354   : > { %1540 = vmatpush.xpose.msk.msra.mxu3 %vm640_vm1, %v1059_v48 }
 0x3ac   : > { %v854_v3 = vpop.permute.xlu2 %853 }
 0x3ad   : > { %v856_v4 = vsel %vm640_vm1, %v768_v0, %v854_v3 }
 0x3ae   : > { %1534 = vmatmul.msk.f32.vlgmr.msrb.gmra.mxu0 %vm857_vm13, %v856_v4 }
 0x42b   : > { %v878_v6 = vpop.f32.mrf.mxu0 }
 0x42c   : > { %v879_v7 = vadd.f32 %v878_v6, %v1969_v5 }
 0x42e   : > { %v881_v8 = vsel %vm640_vm1, %v879_v7, 0.0 }
 0x42f   : > { %882 = vadd.xlane.f32.xlu2 %v881_v8 }
 0x4a2   : > { %v883_v5 = vpop.xlane.xlu2 %882 }
 0x4a3   : > { %v891_v16 = vmul.f32 %v2006_v15, %v883_v5 }
 0x4a5   : > { %v892_v17 = vsub.f32 %v879_v7, %v891_v16 }
 0x4a7   : > { %v893_v18 = vmul.f32 %v892_v17, %v892_v17 }
 0x4a9   : > { %v894_v19 = vsel %vm640_vm1, %v893_v18, 0.0 }
 0x4aa   : > { %895 = vadd.xlane.f32.xlu1 %v894_v19 }
 0x51d   : > { %v896_v29 = vpop.xlane.xlu1 %895 }
 0x51e   : > { %v897_v30 = vmul.f32 %v896_v29, %v2006_v15  ;;  %v976_v29 = vld [vmem:[%s2201_s0 + $0x38] sm:$0xff] }
 0x51f   : > { %1152 = vmatpush.msra.mxu0 %v976_v29 }
 0x520   : > { %v898_v31 = vadd.f32 1e-05, %v897_v30  ;;  %v975_v30 = vld [vmem:[%s2201_s0 + $0x30] sm:$0xff] }
 0x521   : > { %1153 = vmatpush.msra.mxu0 %v975_v30 }
 0x522   : > { %1645 = vrsqrt.f32 %v898_v31  ;;  %vm905_vm0 = vweird.f32 %v898_v31 }
 0x528   : > { %v1646_v32 = vpop.eup %1645 }
 0x529   : > { %v900_v33 = vmul.f32 %v1646_v32, %v898_v31  ;;  %vm906_vm15 = vweird.f32 %v1646_v32  ;;  %v974_v31 = vld [vmem:[%s2201_s0 + $0x28] sm:$0xff] }
 0x52a   : > { %vm907_vm3 = vmor %vm905_vm0, %vm906_vm15  ;;  %1154 = vmatpush.msra.mxu0 %v974_v31 }
 0x52b   : > { %v901_v34 = vmul.f32 %v1646_v32, %v900_v33  ;;  %v972_v33 = vld [vmem:[%s2201_s0 + $0x18] sm:$0xff] }
 0x52d   : > { %v902_v35 = vmul.f32 0.5, %v901_v34  ;;  %v971_v34 = vld [vmem:[%s2201_s0 + $0x10] sm:$0xff] }
 0x52f   : > { %v903_v36 = vsub.f32 1.5, %v902_v35  ;;  %v970_v35 = vld [vmem:[%s2201_s0 + $0x8] sm:$0xff] }
 0x531   : > { %v904_v38 = vmul.f32 %v1646_v32, %v903_v36 }
 0x533   : > { %v908_v40 = vsel %vm907_vm3, %v1646_v32, %v904_v38  ;;  %v973_v32 = vld [vmem:[%s2201_s0 + $0x20] sm:$0xff] }
 0x534   : > { %v909_v41 = vmul.f32 %v908_v40, %v892_v17  ;;  %1155 = vmatpush.msra.mxu0 %v973_v32  ;;  %v969_v38 = vld [vmem:[%s2201_s0] sm:$0xff] }
 0x536   : > { %v911_v43 = vmul.f32 %v910_v39, %v909_v41  ;;  %1156 = vmatpush.msra.mxu0 %v972_v33 }
 0x538   : > { %v2026_v44 = vadd.f32 %v912_v42, %v911_v43  ;;  %1157 = vmatpush.msra.mxu0 %v971_v34 }
 0x53a   : > { %1535 = vmatmul.msk.f32.vlgmr.msrb.gmra.mxu1 %vm640_vm1, %v2026_v44  ;;  %1158 = vmatpush.msra.mxu0 %v970_v35 }
 0x53c   : > { %1159 = vmatpush.msra.mxu0 %v969_v38  ;;  %v1280_v38 = vperm.slane %v2022_v37, 4 }
 0x5b7   : > { %v939_v46 = vpop.f32.mrf.mxu1 }
 0x5b8   : > { %v977_v47 = vmul.f32 0.35355338, %v939_v46 }
 0x5ba   : > { %1056 = vrot.lane.b32.xlu1 %v977_v47, %s1756_s4  ;;  %1538 = vmatmul.msk.f32.vlgmr.msrb.gmra.mxu2 %vm640_vm1, %v977_v47 }
 0x62c   : > { %v1057_v49 = vpop.permute.xlu1 %1056 }
 0x62d   : > { %1541 = vmatmul.msk.f32.vlgmr.msra.gmra.mxu3 %vm640_vm1, %v1057_v49 }
 0x63d   : > { %v1001_v50 = vpop.f32.mrf.mxu2 }
 0x63e   : > { %vm1004_vm4 = vcmp.ne.f32.partialorder %v1001_v50, 0.0 }
 0x63f   : > { %v1005_v51 = vsel %vm1004_vm4, %v1001_v50, -9e+15 }
 0x640   : > { %v1006_v52 = vsel %vm723_vm2, %v1005_v51, -inf }
 0x641   : > { %1007 = vmax.xlane.f32.xlu1 %v1006_v52  ;;  %v1192_v52 = vld [vmem:[%s1942_s22 + $0x10] sm:$0xff] }
 0x6b0   : > { %v1081_v53 = vpop.f32.mrf.mxu3 }
 0x6b1   : > { %vm1084_vm5 = vcmp.ne.f32.partialorder %v1081_v53, 0.0 }
 0x6b2   : > { %v1085_v54 = vsel %vm1084_vm5, %v1081_v53, -9e+15  ;;  %v1190_v53 = vld [vmem:[%s1942_s22] sm:$0xff] }
 0x6b3   : > { %v1086_v55 = vsel %vm723_vm2, %v1085_v54, -inf }
 0x6b4   : > { %1087 = vmax.xlane.f32.xlu0 %v1086_v55  ;;  %v1008_v56 = vpop.xlane.xlu1 %1007  ;;  %v1228_v55 = vld [vmem:[%s1951_s26 + $0x30] sm:$0xff] }
 0x6b5   : > { %v1009_v57 = vsub.f32 %v1005_v51, %v1008_v56  ;;  %v1193_v51 = vld [vmem:[%s1942_s22 + $0x18] sm:$0xff]  ;;  %v1227_v56 = vld [vmem:[%s1951_s26 + $0x28] sm:$0xff] }
 0x6b7   : > { %v1010_v58 = vmul.f32 1.442695, %v1009_v57 }
 0x6b9   : > { %1647 = vpow2.f32 %v1010_v58 }
 0x6bf   : > { %v1648_v59 = vpop.eup %1647 }
 0x6c0   : > { %v1012_v60 = vsel %vm723_vm2, %v1648_v59, 0.0 }
 0x6c1   : > { %1013 = vadd.xlane.f32.xlu0 %v1012_v60 }
 0x727   : > { %v1088_v61 = vpop.xlane.xlu0 %1087 }
 0x728   : > { %v1089_v62 = vsub.f32 %v1085_v54, %v1088_v61  ;;  %v1229_v54 = vld [vmem:[%s1951_s26 + $0x38] sm:$0xff] }
 0x729   : > { %1245 = vmatpush.msrb.mxu3 %v1229_v54  ;;  %v1225_v61 = vld [vmem:[%s1951_s26 + $0x18] sm:$0xff] }
 0x72a   : > { %v1090_v63 = vmul.f32 1.442695, %v1089_v62 }
 0x72b   : > { %1246 = vmatpush.msrb.mxu3 %v1228_v55 }
 0x72c   : > { %1649 = vpow2.f32 %v1090_v63 }
 0x72d   : > { %1247 = vmatpush.msrb.mxu3 %v1227_v56 }
 0x732   : > { %v1650_v0 = vpop.eup %1649 }
 0x733   : > { %v1092_v1 = vsel %vm723_vm2, %v1650_v0, 0.0 }
 0x734   : > { %1093 = vadd.xlane.f32.xlu2 %v1092_v1  ;;  %v1014_v2 = vpop.xlane.xlu0 %1013 }
 0x735   : > { %1651 = vrcp.f32 %v1014_v2  ;;  %v1026_v11 = vand.u32 2147483648, %v1014_v2  ;;  %vm1020_vm7 = vweird.f32 %v1014_v2  ;;  %v1024_v12 = vand.u32 2147483647, %v1014_v2 }
 0x737   : > { %v1027_v17 = vor.u32 1.1754944e-38, %v1026_v11  ;;  %vm1025_vm9 = vcmp.eq.f32.partialorder %v1024_v12, 8.507059e+37  ;;  %v1224_v11 = vld [vmem:[%s1951_s26 + $0x10] sm:$0xff]  ;;  %v1223_v12 = vld [vmem:[%s1951_s26 + $0x8] sm:$0xff] }
 0x73b   : > { %v1652_v3 = vpop.eup %1651 }
 0x73c   : > { %v1016_v4 = vmul.f32 %v1652_v3, %v1014_v2  ;;  %vm1021_vm6 = vweird.f32 %v1652_v3 }
 0x73d   : > { %vm1022_vm8 = vmor %vm1020_vm7, %vm1021_vm6 }
 0x73e   : > { %v1017_v6 = vsub.f32 1.0, %v1016_v4  ;;  %v1186_v4 = vperm.slane %v2022_v37, 2 }
 0x740   : > { %v1018_v8 = vmul.f32 %v1652_v3, %v1017_v6 }
 0x742   : > { %v1019_v9 = vadd.f32 %v1652_v3, %v1018_v8  ;;  %v1188_v8 = vperm.slane %v2022_v37, 3 }
 0x744   : > { %v1023_v5 = vsel %vm1022_vm8, %v1652_v3, %v1019_v9 }
 0x745   : > { %v1028_v21 = vsel %vm1025_vm9, %v1027_v17, %v1023_v5 }
 0x746   : > { %v1029_v26 = vmul.f32 %v1648_v59, %v1028_v21  ;;  %v1226_v59 = vld [vmem:[%s1951_s26 + $0x20] sm:$0xff] }
 0x747   : > { %1248 = vmatpush.msrb.mxu3 %v1226_v59 }
 0x749   : > { %1249 = vmatpush.msrb.mxu3 %v1225_v61 }
 0x74b   : > { %1250 = vmatpush.msrb.mxu3 %v1224_v11 }
 0x74c   : > { %1110 = vrot.lane.b32.xlu2 %v966_v45, %s1757_s5 }
 0x74d   : > { %1251 = vmatpush.msrb.mxu3 %v1223_v12 }
 0x754   : > { %1030 = vrot.lane.b32.xlu2 %v966_v45, %s1755_s3 }
 0x7a7   : > { %v1094_v7 = vpop.xlane.xlu2 %1093 }
 0x7a8   : > { %1653 = vrcp.f32 %v1094_v7  ;;  %v1106_v18 = vand.u32 2147483648, %v1094_v7  ;;  %v1104_v20 = vand.u32 2147483647, %v1094_v7  ;;  %vm1100_vm11 = vweird.f32 %v1094_v7 }
 0x7aa   : > { %v1107_v23 = vor.u32 1.1754944e-38, %v1106_v18  ;;  %vm1105_vm14 = vcmp.eq.f32.partialorder %v1104_v20, 8.507059e+37  ;;  %v1634_v18 = vld [vmem:[%s618_s1] ss:$0 sm:$0xff] }
 0x7ae   : > { %v1654_v10 = vpop.eup %1653 }
 0x7af   : > { %v1096_v13 = vmul.f32 %v1654_v10, %v1094_v7  ;;  %v1111_v14 = vpop.permute.xlu2 %1110  ;;  %vm1101_vm10 = vweird.f32 %v1654_v10 }
 0x7b0   : > { %1131 = vmatpush.msra.mxu2 %v1111_v14  ;;  %vm1102_vm12 = vmor %vm1100_vm11, %vm1101_vm10  ;;  %v1633_v14 = vld [vmem:[%s610_s14] ss:$0 sm:$0xff] }
 0x7b1   : > { %v1097_v16 = vsub.f32 1.0, %v1096_v13  ;;  %v1222_v13 = vld [vmem:[%s1951_s26] sm:$0xff] }
 0x7b2   : > { %1252 = vmatpush.msrb.mxu3 %v1222_v13 }
 0x7b3   : > { %v1098_v19 = vmul.f32 %v1654_v10, %v1097_v16 }
 0x7b5   : > { %v1099_v22 = vadd.f32 %v1654_v10, %v1098_v19 }
 0x7b7   : > { %v1103_v24 = vsel %vm1102_vm12, %v1654_v10, %v1099_v22  ;;  %v1031_v25 = vpop.permute.xlu2 %1030 }
 0x7b8   : > { %v1108_v27 = vsel %vm1105_vm14, %v1107_v23, %v1103_v24  ;;  %1051 = vmatpush.msra.mxu1 %v1031_v25 }
 0x7b9   : > { %1539 = vmatmul.msk.f32.vlgmr.msra.gmra.mxu1 %vm723_vm2, %v1029_v26  ;;  %v1109_v28 = vmul.f32 %v1650_v0, %v1108_v27 }
 0x7ba   : > { %1213 = vmatpush.msrb.mxu1 %v1193_v51 }
 0x7bb   : > { %1542 = vmatmul.msk.f32.vlgmr.msra.gmra.mxu2 %vm723_vm2, %v1109_v28 }
 0x7bc   : > { %1214 = vmatpush.msrb.mxu1 %v1192_v52 }
 0x836   : > { %v1053_v39 = vpop.f32.mrf.mxu1 }
 0x83e   : > { %v1133_v36 = vpop.f32.mrf.mxu2 }
 0x83f   : > { %1137 = vrot.lane.b32.xlu1 %v1133_v36, %s1757_s5 }
 0x8b1   : > { %v1138_v40 = vpop.permute.xlu1 %1137 }
 0x8b2   : > { %v1140_v41 = vsel %vm640_vm1, %v1053_v39, %v1138_v40  ;;  %v1282_v40 = vperm.slane %v2022_v37, 5 }
 0x8b3   : > { %1543 = vmatmul.msk.f32.vlgmr.msra.gmra.mxu0 %vm857_vm13, %v1140_v41 }
 0x930   : > { %v1161_v42 = vpop.f32.mrf.mxu0 }
 0x931   : > { %v1162_v43 = vadd.f32 %v1161_v42, %v2026_v44  ;;  %v1191_v44 = vld [vmem:[%s1942_s22 + $0x8] sm:$0xff] }
 0x932   : > { %1215 = vmatpush.msrb.mxu1 %v1191_v44 }
 0x933   : > { %v1164_v45 = vsel %vm640_vm1, %v1162_v43, 0.0 }
 0x934   : > { %1165 = vadd.xlane.f32.xlu0 %v1164_v45  ;;  %1216 = vmatpush.msrb.mxu1 %v1190_v53 }
 0x9a7   : > { %v1166_v46 = vpop.xlane.xlu0 %1165 }
 0x9a8   : > { %v1167_v47 = vmul.f32 %v1166_v46, %v2006_v15 }
 0x9aa   : > { %v1168_v48 = vsub.f32 %v1162_v43, %v1167_v47 }
 0x9ac   : > { %v1169_v49 = vmul.f32 %v1168_v48, %v1168_v48 }
 0x9ae   : > { %v1170_v50 = vsel %vm640_vm1, %v1169_v49, 0.0 }
 0x9af   : > { %1171 = vadd.xlane.f32.xlu2 %v1170_v50 }
 0xa22   : > { %v1172_v57 = vpop.xlane.xlu2 %1171 }
 0xa23   : > { %v1173_v58 = vmul.f32 %v1172_v57, %v2006_v15 }
 0xa25   : > { %v1174_v60 = vadd.f32 1e-05, %v1173_v58 }
 0xa27   : > { %1655 = vrsqrt.f32 %v1174_v60  ;;  %vm1181_vm15 = vweird.f32 %v1174_v60 }
 0xa2d   : > { %v1656_v62 = vpop.eup %1655 }
 0xa2e   : > { %v1176_v63 = vmul.f32 %v1656_v62, %v1174_v60  ;;  %vm1182_vm2 = vweird.f32 %v1656_v62 }
 0xa2f   : > { %vm1183_vm0 = vmor %vm1181_vm15, %vm1182_vm2 }
 0xa30   : > { %v1177_v0 = vmul.f32 %v1656_v62, %v1176_v63 }
 0xa32   : > { %v1178_v1 = vmul.f32 0.5, %v1177_v0 }
 0xa34   : > { %v1179_v2 = vsub.f32 1.5, %v1178_v1 }
 0xa36   : > { %v1180_v3 = vmul.f32 %v1656_v62, %v1179_v2 }
 0xa38   : > { %v1184_v6 = vsel %vm1183_vm0, %v1656_v62, %v1180_v3 }
 0xa39   : > { %v1185_v7 = vmul.f32 %v1184_v6, %v1168_v48 }
 0xa3b   : > { %v1187_v9 = vmul.f32 %v1186_v4, %v1185_v7 }
 0xa3d   : > { %v1189_v10 = vadd.f32 %v1188_v8, %v1187_v9 }
 0xa3f   : > { %1544 = vmatmul.msk.f32.vlgmr.msrb.gmra.mxu1 %vm640_vm1, %v1189_v10 }
 0xabc   : > { %v1218_v5 = vpop.f32.mrf.mxu1 }
 0xabd   : > { %v1219_v16 = vadd.f32 %v1633_v14, %v1218_v5 }
 0xabf   : > { %v1221_v17 = vmax.f32 %v1219_v16, 0.0 }
 0xac1   : > { %1545 = vmatmul.msk.f32.vlgmr.msrb.gmra.mxu3 %vm857_vm13, %v1221_v17 }
 0xb44   : > { %v1254_v19 = vpop.f32.mrf.mxu3 }
 0xb45   : > { %v1255_v20 = vadd.f32 %v1634_v18, %v1254_v19 }
 0xb47   : > { %v1257_v21 = vadd.f32 %v1255_v20, %v1189_v10 }
 0xb49   : > { %v1258_v22 = vsel %vm640_vm1, %v1257_v21, 0.0 }
 0xb4a   : > { %1259 = vadd.xlane.f32.xlu0 %v1258_v22 }
 0xbbd   : > { %v1260_v23 = vpop.xlane.xlu0 %1259 }
 0xbbe   : > { %v1261_v24 = vmul.f32 %v1260_v23, %v2006_v15 }
 0xbc0   : > { %v1262_v25 = vsub.f32 %v1257_v21, %v1261_v24 }
 0xbc2   : > { %v1263_v26 = vmul.f32 %v1262_v25, %v1262_v25 }
 0xbc4   : > { %v1264_v27 = vsel %vm640_vm1, %v1263_v26, 0.0 }
 0xbc5   : > { %1265 = vadd.xlane.f32.xlu0 %v1264_v27 }
 0xc38   : > { %v1266_v28 = vpop.xlane.xlu0 %1265 }
 0xc39   : > { %v1267_v29 = vmul.f32 %v1266_v28, %v2006_v15 }
 0xc3b   : > { %v1268_v30 = vadd.f32 1e-05, %v1267_v29 }
 0xc3d   : > { %1657 = vrsqrt.f32 %v1268_v30  ;;  %vm1275_vm3 = vweird.f32 %v1268_v30 }
 0xc43   : > { %v1658_v31 = vpop.eup %1657 }
 0xc44   : > { %v1270_v32 = vmul.f32 %v1658_v31, %v1268_v30  ;;  %vm1276_vm13 = vweird.f32 %v1658_v31 }
 0xc45   : > { %vm1277_vm4 = vmor %vm1275_vm3, %vm1276_vm13 }
 0xc46   : > { %v1271_v33 = vmul.f32 %v1658_v31, %v1270_v32 }
 0xc48   : > { %v1272_v34 = vmul.f32 0.5, %v1271_v33 }
 0xc4a   : > { %v1273_v35 = vsub.f32 1.5, %v1272_v34 }
 0xc4c   : > { %v1274_v36 = vmul.f32 %v1658_v31, %v1273_v35 }
 0xc4e   : > { %v1278_v39 = vsel %vm1277_vm4, %v1658_v31, %v1274_v36 }
 0xc4f   : > { %v1279_v41 = vmul.f32 %v1278_v39, %v1262_v25 }
 0xc51   : > { %v1281_v42 = vmul.f32 %v1280_v38, %v1279_v41  ;;  %1288 = sbr.rel (%p1546_p1) target bundleno = 3159 (0xc57), region = 76 }
 0xc53   : > { %v1283_v43 = vadd.f32 %v1282_v40, %v1281_v42 }
 0xc55   : > { %1284 = vst.msk [vmem:[#allocation2] sm:$0xff] %vm640_vm1, %v1283_v43 }
 0xc56   : > { %1289 = vst.msk [vmem:[%s569_s16] sm:$0xff] %vm640_vm1, %v1283_v43 }
 0xc57 PF: > { %s2202_s13 = sld [smem:[#allocation9_spill]]  ;;  %s1303_s18 = sshll.u32 %s569_s16, 4  ;;  %s1304_s18 = int_to_ptr.vmem [resolvable:$true] %s1303_s18 }
 0xc58   : > { %s2203_s20 = sld [smem:[#allocation7_spill]] }
 0xc59   : > { %s2205_s22 = sld [smem:[#allocation26_spill]] }
 0xc5d   : > { %s1548_s17 = sshll.u32 %s2202_s13, 3 }
 0xc5e   : > { %s2207_s24 = sand.u32 1, %s2203_s20  }
 0xc5f   : > { %s2206_s15 = smov %s2205_s22  ;;  %s1301_s14 = scalar_lea.hbm %s2205_s22, %s1548_s17 }
 0xc60   : > { %s1305_s26 = sshll.u32 %s1301_s14, 4  ;;  %s1291_s19 = scalar_lea.sflag [#allocation4], %s2207_s24  ;;  %s1306_s26 = int_to_ptr.hbm [resolvable:$true] %s1305_s26 }
 0xc61   : > { %s1673_s1 = sshra.s32 %s1306_s26, 4  ;;  %s1679_s4 = scalar_lea.hbm %s2206_s15, 16  ;;  %s1674_s1 = int_to_ptr.hbm [resolvable:$true] %s1673_s1 }
 0xc62   : > { %s1675_s25 = scalar_lea.hbm %s1674_s1, 8  ;;  %p1680_p6 = scmp.lt.s32.totalorder %s1674_s1, %s2206_s15 }
 0xc63   : > { %p1676_p2 = scmp.ne.s32.totalorder %s1674_s1, %s1675_s25  ;;  %p1681_p7 = scmp.lt.s32.totalorder %s1679_s4, %s1675_s25 }
 0xc65   : > { %p1677_p4 = pnand %p1676_p2, %p1873_p3  ;;  %p1682_p8 = por %p1681_p7, %p1680_p6 }
 0xc67   : > { %p1678_p5 = pneg %p1677_p4 }
 0xc69   : > { %p1683_p10 = pnand %p1682_p8, %p1678_p5 }
 0xc6b   : > { %1686 = shalt.err (!%p1683_p10)
}
 0xc6c   : > { %1558 = dma.vmem_to_hbm [thread:$0]  (%p1873_p3), %s1304_s18, 128, %s1306_s26, %s1291_s19  }
 0xc6d PF: > { %s2208_s29 = sld [smem:[#allocation12_spill]] }
 0xc6e   : > { %s2209_s16 = sld [smem:[#allocation6_spill]] }
 0xc73   : > { %p1564_p11 = scmp.ge.s32.totalorder %s2208_s29, 2 }
 0xc74   : > { %s1317_s12 = sand.u32 1, %s2209_s16  }
 0xc75   : > { %p1561_p12 = pnand %p1564_p11, %p1883_p9  ;;  %s1318_s23 = scalar_lea.sflag [#allocation4], %s1317_s12 }
 0xc77   : > { %p1562_p13 = pneg %p1561_p12 }
 0xc79   : > { %1720 = dma.done.wait (%p1562_p13), %s1318_s23, 128  }
 0xc7a   : > { %1722 = vsyncadd (%p1562_p13), %s1318_s23, 4294967168  ;;  %s25_s28 = sadd.s32 1, %s2208_s29   ;;  %s2211_s21 = sld [smem:[#allocation7_spill]] }
 0xc7b   : > { %p22_p0 = scmp.ge.s32.totalorder %s25_s28, 6   ;;  %s2212_s22 = sld [smem:[#allocation8_spill]] }
 0xc7c   : > { %s2213_s23 = sld [smem:[#allocation17_spill]] }
 0xc7d   : > { %s2214_s24 = sld [smem:[#allocation10_spill]]  ;;  %24 = sbr.rel (!%p22_p0) target bundleno = 14 (0xe), region = 144 }
 0xc7e   : > { %s2215_s25 = sld [smem:[#allocation11_spill]] }
 0xc7f   : > { %s2216_s26 = sld [smem:[#allocation13_spill]] }
 0xc80   : > { %s2217_s27 = sld [smem:[#allocation15_spill]] }
 0xc82   :  { %1324 = vsyncpa [#allocation4], 1 }
 0xc83   :  { %1326 = vsyncpa [#allocation4 + $0x1], 1 }

</bundles_post_ra>
